<compile_context>
chip_gen: v6e
topology: v6e:2x2x1
jax: 0.10.0
libtpu: 0.0.40
codegen_flags: <defaults>
</compile_context>

<pallas_src>
import math
import jax
import jax.numpy as jnp
from jax.experimental import pallas as pl
from jax.experimental.pallas import tpu as pltpu

# ---- small model config (consistent with ModelArgs, scaled down) ------------
B, S, D, H, L = 2, 8, 32, 4, 2          # batch, seq, dim, n_heads, n_layers
MULTIPLE_OF = 16
HD = D // H                              # head dim (full-fraction interleaved rotary)
HD2 = HD // 2                            # rotary pairs per head
EPS = 1e-6
SCALE = 1.0 / math.sqrt(HD)
THETA = 10000.0


def _n_inner(n_embd, multiple_of):       # same formula as get_n_inner_dim
    n = int(2 * (4 * n_embd) / 3)
    return (n - 1) // multiple_of * multiple_of + multiple_of


I = _n_inner(D, MULTIPLE_OF)             # swiglu hidden size (96)


# ------------------------------- kernel --------------------------------------
def roformer_layer_kernel(h_ref, n1_ref, n2_ref, wq_ref, wk_ref, wv_ref, wo_ref,
                          w1_ref, wg_ref, fc2_ref, nf_ref, cos_ref, sin_ref,
                          o_ref, resid_ref):
    l = pl.program_id(1)

    @pl.when(l == 0)
    def _():                                           # new batch item -> load residual
        resid_ref[...] = h_ref[0].astype(jnp.float32)

    resid = resid_ref[...]                             # (S, D) f32 residual
    cos = cos_ref[...]                                 # (S, HD2)
    sin = sin_ref[...]                                 # (S, HD2)

    row = jax.lax.broadcasted_iota(jnp.int32, (S, S), 0)
    col = jax.lax.broadcasted_iota(jnp.int32, (S, S), 1)
    causal = col <= row                                # (S, S); broadcasts over heads

    def rmsnorm(x, w):
        var = jnp.mean(x * x, axis=-1, keepdims=True)
        return x * jax.lax.rsqrt(var + EPS) * w

    def rope_head(xh):
        # rotate-half rotary on one head's (S, HD) slice.  Weight columns were
        # permuted to [evens | odds] per head at init, so this equals the
        # reference interleaved rotary.  Pure VPU mul/add.
        xe, xo = xh[:, :HD2], xh[:, HD2:]
        return jnp.concatenate([xe * cos - xo * sin, xo * cos + xe * sin], axis=-1)

    # ---------------- attention block ----------------
    x = rmsnorm(resid, n1_ref[0])                      # (S, D) f32
    xb = x.astype(jnp.bfloat16)
    # full-width projections (single lane-wide matmul each; scale folded in wq)
    q = jnp.dot(xb, wq_ref[0], preferred_element_type=jnp.float32)   # (S, D)
    k = jnp.dot(xb, wk_ref[0], preferred_element_type=jnp.float32)   # (S, D)
    v = jnp.dot(xb, wv_ref[0], preferred_element_type=jnp.float32)   # (S, D)

    # head split (static lane slices + stack -> (H, S, HD); layout only)
    q_heads, k_heads, v_heads = [], [], []
    for hh in range(H):
        sl = slice(hh * HD, (hh + 1) * HD)
        q_heads.append(rope_head(q[:, sl]))
        k_heads.append(rope_head(k[:, sl]))
        v_heads.append(v[:, sl])
    qh = jnp.stack(q_heads).astype(jnp.bfloat16)        # (H, S, HD)
    kh = jnp.stack(k_heads).astype(jnp.bfloat16)
    vh = jnp.stack(v_heads).astype(jnp.bfloat16)

    # single full-HD score contraction per head
    s = jnp.einsum('hsd,htd->hst', qh, kh,
                   preferred_element_type=jnp.float32)   # (H, S, S)
    s = jnp.where(causal, s, -1e30)
    m = jnp.max(s, axis=-1, keepdims=True)
    p = jnp.exp(s - m)
    p = p * pl.reciprocal(jnp.sum(p, axis=-1, keepdims=True), approx=True)

    o3 = jnp.einsum('hst,htd->hsd', p.astype(jnp.bfloat16), vh,
                    preferred_element_type=jnp.float32)  # (H, S, HD)
    attn = jnp.concatenate([o3[hh] for hh in range(H)], axis=-1)      # (S, D)
    y = jnp.dot(attn.astype(jnp.bfloat16), wo_ref[0],
                preferred_element_type=jnp.float32)      # single out-proj matmul
    # TODO(synk): attn_pdrop / resid_pdrop dropout omitted (eval-mode identity)
    resid = resid + y

    # ---------------- SwiGLU MLP block ----------------
    xm = rmsnorm(resid, n2_ref[0]).astype(jnp.bfloat16)
    y1 = jnp.dot(xm, w1_ref[0], preferred_element_type=jnp.float32)   # (S, I)
    g = jnp.dot(xm, wg_ref[0], preferred_element_type=jnp.float32)    # (S, I)
    act = y1 * (g * jax.nn.sigmoid(g))                   # y * silu(gate), f32
    resid = resid + jnp.dot(act.astype(jnp.bfloat16), fc2_ref[0],
                            preferred_element_type=jnp.float32)

    resid_ref[...] = resid

    @pl.when(l == pl.num_programs(1) - 1)
    def _():                                              # last layer -> final norm
        o_ref[0] = rmsnorm(resid, nf_ref[...]).astype(o_ref.dtype)


# ------------------------------- wrapper --------------------------------------
def roformer_forward(h, kparams):
    grid_spec = pltpu.PrefetchScalarGridSpec(
        num_scalar_prefetch=0,
        grid=(B, L),                                      # batch (parallel) x layer (arbitrary)
        in_specs=[
            pl.BlockSpec((1, S, D), lambda b, l: (b, 0, 0)),   # hidden states
            pl.BlockSpec((1, 1, D), lambda b, l: (l, 0, 0)),   # n1 (per layer)
            pl.BlockSpec((1, 1, D), lambda b, l: (l, 0, 0)),   # n2
            pl.BlockSpec((1, D, D), lambda b, l: (l, 0, 0)),   # wq
            pl.BlockSpec((1, D, D), lambda b, l: (l, 0, 0)),   # wk
            pl.BlockSpec((1, D, D), lambda b, l: (l, 0, 0)),   # wv
            pl.BlockSpec((1, D, D), lambda b, l: (l, 0, 0)),   # wo
            pl.BlockSpec((1, D, I), lambda b, l: (l, 0, 0)),   # w1 (fc1 value half)
            pl.BlockSpec((1, D, I), lambda b, l: (l, 0, 0)),   # wg (fc1 gate half)
            pl.BlockSpec((1, I, D), lambda b, l: (l, 0, 0)),   # fc2
            pl.BlockSpec((1, D),    lambda b, l: (0, 0)),      # final norm
            pl.BlockSpec((S, HD2),  lambda b, l: (0, 0)),      # cos table
            pl.BlockSpec((S, HD2),  lambda b, l: (0, 0)),      # sin table
        ],
        out_specs=pl.BlockSpec((1, S, D), lambda b, l: (b, 0, 0)),
        scratch_shapes=[pltpu.VMEM((S, D), jnp.float32)],      # f32 residual accumulator
    )
    return pl.pallas_call(
        roformer_layer_kernel,
        out_shape=jax.ShapeDtypeStruct((B, S, D), jnp.float32),
        grid_spec=grid_spec,
        compiler_params=pltpu.CompilerParams(
            dimension_semantics=("parallel", "arbitrary"),
            vmem_limit_bytes=32 * 1024 * 1024,                 # explicit budget for the
        ),                                                     # double-buffered layer block
    )(h, *kparams)


# ---------------------------- parameter setup ---------------------------------
def init_base_params(key):
    std = 0.02 / math.sqrt(2 * L)
    ks = jax.random.split(key, 7)
    p = dict(
        wq=jax.random.normal(ks[0], (L, D, D), jnp.float32) * std,
        wk=jax.random.normal(ks[1], (L, D, D), jnp.float32) * std,
        wv=jax.random.normal(ks[2], (L, D, D), jnp.float32) * std,
        wo=jax.random.normal(ks[3], (L, D, D), jnp.float32) * std,
        w1=jax.random.normal(ks[4], (L, D, I), jnp.float32) * std,   # fc1 (value half)
        wg=jax.random.normal(ks[5], (L, D, I), jnp.float32) * std,   # fc1 (gate half)
        fc2=jax.random.normal(ks[6], (L, I, D), jnp.float32) * std,
        n1=jnp.ones((L, 1, D), jnp.float32),
        n2=jnp.ones((L, 1, D), jnp.float32),
        nf=jnp.ones((1, D), jnp.float32),
    )
    # rotary tables (== precompute_freqs_cis, interleaved layout, start_pos=0)
    inv_freq = 1.0 / (THETA ** (jnp.arange(0, HD, 2, dtype=jnp.float32)[:HD2] / HD))
    ang = jnp.outer(jnp.arange(S, dtype=jnp.float32), inv_freq)      # (S, HD2)
    p['cos'] = jnp.cos(ang)
    p['sin'] = jnp.sin(ang)
    return p


def prepare_kernel_params(p):
    # de-interleave column order within each head: [0,2,..,HD-2, 1,3,..,HD-1]
    # (head blocks stay contiguous, so per-head scores are unchanged)
    local = jnp.concatenate([jnp.arange(0, HD, 2), jnp.arange(1, HD, 2)])
    cols = (jnp.arange(H)[:, None] * HD + local[None, :]).reshape(-1)

    wq = (p['wq'] * SCALE)[:, :, cols].astype(jnp.bfloat16)  # softmax scale folded in
    wk = p['wk'][:, :, cols].astype(jnp.bfloat16)
    wv = p['wv'].astype(jnp.bfloat16)                        # original column order
    wo = p['wo'].astype(jnp.bfloat16)
    return (p['n1'], p['n2'], wq, wk, wv, wo,
            p['w1'].astype(jnp.bfloat16), p['wg'].astype(jnp.bfloat16),
            p['fc2'].astype(jnp.bfloat16), p['nf'], p['cos'], p['sin'])


# ---------------------------- pure-JAX reference -------------------------------
def roformer_ref(h, p):
    cos_f = jnp.tile(p['cos'], (1, H))        # (S, D//2) per rotary pair
    sin_f = jnp.tile(p['sin'], (1, H))

    def rmsnorm(x, w):
        return x * jax.lax.rsqrt(jnp.mean(x * x, -1, keepdims=True) + EPS) * w

    def rope(x):                              # interleaved rotary (reference form)
        xr = x.reshape(S, D // 2, 2)
        x0, x1 = xr[..., 0], xr[..., 1]
        o0 = x0 * cos_f - x1 * sin_f
        o1 = x1 * cos_f + x0 * sin_f
        return jnp.stack([o0, o1], axis=-1).reshape(S, D)

    causal = jnp.arange(S)[None, :] <= jnp.arange(S)[:, None]
    out = []
    for b in range(B):
        resid = h[b].astype(jnp.float32)
        for l in range(L):
            x = rmsnorm(resid, p['n1'][l])
            q, k, v = rope(x @ p['wq'][l]), rope(x @ p['wk'][l]), x @ p['wv'][l]
            heads = []
            for hh in range(H):
                sl = slice(hh * HD, (hh + 1) * HD)
                sc = (q[:, sl] @ k[:, sl].T) * SCALE
                sc = jnp.where(causal, sc, -1e30)
                heads.append(jax.nn.softmax(sc, axis=-1) @ v[:, sl])
            resid = resid + jnp.concatenate(heads, -1) @ p['wo'][l]
            x = rmsnorm(resid, p['n2'][l])
            resid = resid + ((x @ p['w1'][l]) * jax.nn.silu(x @ p['wg'][l])) @ p['fc2'][l]
        out.append(rmsnorm(resid, p['nf']))
    return jnp.stack(out)


if __name__ == "__main__":
    key = jax.random.PRNGKey(0)
    kx, kp = jax.random.split(key)
    h = jax.random.normal(kx, (B, S, D), jnp.float32)
    base = init_base_params(kp)
    kparams = prepare_kernel_params(base)

    out = roformer_forward(h, kparams)
    jax.block_until_ready(out)
    assert out.shape == (B, S, D)

    ref = roformer_ref(h, base)
    assert jnp.allclose(out, ref, atol=1e-2, rtol=1e-2), "mismatch vs JAX reference"

    print("KERNEL_OK")
</pallas_src>

<mosaic_0001>
module attributes {stable_mosaic.version = 11 : i64} {
  func.func @roformer_layer_kernel(%arg0: i32, %arg1: i32, %arg2: memref<1x8x32xf32, #tpu.memory_space<vmem>>, %arg3: memref<1x1x32xf32, #tpu.memory_space<vmem>>, %arg4: memref<1x1x32xf32, #tpu.memory_space<vmem>>, %arg5: memref<1x32x32xbf16, #tpu.memory_space<vmem>>, %arg6: memref<1x32x32xbf16, #tpu.memory_space<vmem>>, %arg7: memref<1x32x32xbf16, #tpu.memory_space<vmem>>, %arg8: memref<1x32x32xbf16, #tpu.memory_space<vmem>>, %arg9: memref<1x32x96xbf16, #tpu.memory_space<vmem>>, %arg10: memref<1x32x96xbf16, #tpu.memory_space<vmem>>, %arg11: memref<1x96x32xbf16, #tpu.memory_space<vmem>>, %arg12: memref<1x32xf32, #tpu.memory_space<vmem>>, %arg13: memref<8x4xf32, #tpu.memory_space<vmem>>, %arg14: memref<8x4xf32, #tpu.memory_space<vmem>>, %arg15: memref<1x8x32xf32, #tpu.memory_space<vmem>>, %arg16: memref<8x32xf32, #tpu.memory_space<vmem>>) attributes {dimension_semantics = [#tpu.dimension_semantics<parallel>, #tpu.dimension_semantics<arbitrary>], iteration_bounds = array<i64: 2, 2>, scalar_prefetch = 0 : i64, scratch_operands = 1 : i64, tpu.core_type = #tpu.core_type<tc>, window_params = [{transform_indices = @transform_0, window_bounds = array<i64: 1, 8, 32>}, {transform_indices = @transform_1, window_bounds = array<i64: 1, 1, 32>}, {transform_indices = @transform_2, window_bounds = array<i64: 1, 1, 32>}, {transform_indices = @transform_3, window_bounds = array<i64: 1, 32, 32>}, {transform_indices = @transform_4, window_bounds = array<i64: 1, 32, 32>}, {transform_indices = @transform_5, window_bounds = array<i64: 1, 32, 32>}, {transform_indices = @transform_6, window_bounds = array<i64: 1, 32, 32>}, {transform_indices = @transform_7, window_bounds = array<i64: 1, 32, 96>}, {transform_indices = @transform_8, window_bounds = array<i64: 1, 32, 96>}, {transform_indices = @transform_9, window_bounds = array<i64: 1, 96, 32>}, {pipeline_mode = #tpu.pipeline_mode<synchronous>, transform_indices = @transform_10, window_bounds = array<i64: 1, 32>}, {pipeline_mode = #tpu.pipeline_mode<synchronous>, transform_indices = @transform_11, window_bounds = array<i64: 8, 4>}, {pipeline_mode = #tpu.pipeline_mode<synchronous>, transform_indices = @transform_12, window_bounds = array<i64: 8, 4>}, {transform_indices = @transform_13, window_bounds = array<i64: 1, 8, 32>}]} {
    %c0_i32 = arith.constant 0 : i32
    %0 = arith.cmpi eq, %arg1, %c0_i32 : i32
    %1 = arith.extui %0 : i1 to i32
    %c0_i32_0 = arith.constant 0 : i32
    %2 = arith.cmpi ne, %1, %c0_i32_0 : i32
    scf.if %2 {
      %c0_54 = arith.constant 0 : index
      %c0_55 = arith.constant 0 : index
      %c0_56 = arith.constant 0 : index
      %203 = vector.load %arg2[%c0_54, %c0_55, %c0_56] : memref<1x8x32xf32, #tpu.memory_space<vmem>>, vector<1x8x32xf32>
      %204 = vector.shape_cast %203 : vector<1x8x32xf32> to vector<8x32xf32>
      %c0_57 = arith.constant 0 : index
      %c0_58 = arith.constant 0 : index
      %205 = vector.load %arg16[%c0_57, %c0_58] : memref<8x32xf32, #tpu.memory_space<vmem>>, vector<8x32xf32>
      tpu.vector_store %arg16[%c0_57, %c0_58], %204 {strides = array<i32>} : memref<8x32xf32, #tpu.memory_space<vmem>>, vector<8x32xf32>,
    } else {
    }
    %c0 = arith.constant 0 : index
    %c0_1 = arith.constant 0 : index
    %3 = vector.load %arg16[%c0, %c0_1] : memref<8x32xf32, #tpu.memory_space<vmem>>, vector<8x32xf32>
    %c0_2 = arith.constant 0 : index
    %c0_3 = arith.constant 0 : index
    %4 = vector.load %arg13[%c0_2, %c0_3] : memref<8x4xf32, #tpu.memory_space<vmem>>, vector<8x4xf32>
    %c0_4 = arith.constant 0 : index
    %c0_5 = arith.constant 0 : index
    %5 = vector.load %arg14[%c0_4, %c0_5] : memref<8x4xf32, #tpu.memory_space<vmem>>, vector<8x4xf32>
    %6 = tpu.iota {dimensions = array<i32: 0>} : vector<8x8xi32>
    %7 = tpu.iota {dimensions = array<i32: 1>} : vector<8x8xi32>
    %8 = arith.cmpi sle, %7, %6 : vector<8x8xi32>
    %c0_6 = arith.constant 0 : index
    %c0_7 = arith.constant 0 : index
    %c0_8 = arith.constant 0 : index
    %9 = vector.load %arg3[%c0_6, %c0_7, %c0_8] : memref<1x1x32xf32, #tpu.memory_space<vmem>>, vector<1x1x32xf32>
    %10 = vector.shape_cast %9 : vector<1x1x32xf32> to vector<1x32xf32>
    %11 = arith.mulf %3, %3 : vector<8x32xf32>
    %cst = arith.constant dense<0.000000e+00> : vector<8xf32>
    %12 = vector.multi_reduction <add>, %11, %cst [1] : vector<8x32xf32> to vector<8xf32>
    %13 = vector.shape_cast %12 : vector<8xf32> to vector<8x1xf32>
    %cst_9 = arith.constant 3.200000e+01 : f32
    %14 = vector.broadcast %cst_9 : f32 to vector<8x1xf32>
    %15 = arith.divf %13, %14 : vector<8x1xf32>
    %cst_10 = arith.constant 9.99999997E-7 : f32
    %16 = vector.broadcast %cst_10 : f32 to vector<8x1xf32>
    %17 = arith.addf %15, %16 : vector<8x1xf32>
    %18 = math.rsqrt %17 : vector<8x1xf32>
    %19 = vector.broadcast %18 : vector<8x1xf32> to vector<8x32xf32>
    %20 = arith.mulf %3, %19 : vector<8x32xf32>
    %21 = vector.broadcast %10 : vector<1x32xf32> to vector<8x32xf32>
    %22 = arith.mulf %20, %21 : vector<8x32xf32>
    %23 = arith.truncf %22 : vector<8x32xf32> to vector<8x32xbf16>
    %c0_11 = arith.constant 0 : index
    %c0_12 = arith.constant 0 : index
    %c0_13 = arith.constant 0 : index
    %24 = vector.load %arg5[%c0_11, %c0_12, %c0_13] : memref<1x32x32xbf16, #tpu.memory_space<vmem>>, vector<1x32x32xbf16>
    %25 = vector.shape_cast %24 : vector<1x32x32xbf16> to vector<32x32xbf16>
    %cst_14 = arith.constant dense<0.000000e+00> : vector<8x32xf32>
    %26 = tpu.matmul %23, %25, %cst_14 {dimension_numbers = #tpu.dot_dimension_numbers<[1], [0], [0], [1], [0, 0, 1, 1], [], []>} : vector<8x32xbf16>, vector<32x32xbf16>, vector<8x32xf32> -> vector<8x32xf32>
    %c0_15 = arith.constant 0 : index
    %c0_16 = arith.constant 0 : index
    %c0_17 = arith.constant 0 : index
    %27 = vector.load %arg6[%c0_15, %c0_16, %c0_17] : memref<1x32x32xbf16, #tpu.memory_space<vmem>>, vector<1x32x32xbf16>
    %28 = vector.shape_cast %27 : vector<1x32x32xbf16> to vector<32x32xbf16>
    %cst_18 = arith.constant dense<0.000000e+00> : vector<8x32xf32>
    %29 = tpu.matmul %23, %28, %cst_18 {dimension_numbers = #tpu.dot_dimension_numbers<[1], [0], [0], [1], [0, 0, 1, 1], [], []>} : vector<8x32xbf16>, vector<32x32xbf16>, vector<8x32xf32> -> vector<8x32xf32>
    %c0_19 = arith.constant 0 : index
    %c0_20 = arith.constant 0 : index
    %c0_21 = arith.constant 0 : index
    %30 = vector.load %arg7[%c0_19, %c0_20, %c0_21] : memref<1x32x32xbf16, #tpu.memory_space<vmem>>, vector<1x32x32xbf16>
    %31 = vector.shape_cast %30 : vector<1x32x32xbf16> to vector<32x32xbf16>
    %cst_22 = arith.constant dense<0.000000e+00> : vector<8x32xf32>
    %32 = tpu.matmul %23, %31, %cst_22 {dimension_numbers = #tpu.dot_dimension_numbers<[1], [0], [0], [1], [0, 0, 1, 1], [], []>} : vector<8x32xbf16>, vector<32x32xbf16>, vector<8x32xf32> -> vector<8x32xf32>
    %33 = vector.extract_strided_slice %26 {offsets = [0, 0], sizes = [8, 8], strides = [1, 1]} : vector<8x32xf32> to vector<8x8xf32>
    %34 = vector.extract_strided_slice %33 {offsets = [0, 0], sizes = [8, 4], strides = [1, 1]} : vector<8x8xf32> to vector<8x4xf32>
    %35 = vector.extract_strided_slice %33 {offsets = [0, 4], sizes = [8, 4], strides = [1, 1]} : vector<8x8xf32> to vector<8x4xf32>
    %36 = arith.mulf %34, %4 : vector<8x4xf32>
    %37 = arith.mulf %35, %5 : vector<8x4xf32>
    %38 = arith.subf %36, %37 : vector<8x4xf32>
    %39 = arith.mulf %35, %4 : vector<8x4xf32>
    %40 = arith.mulf %34, %5 : vector<8x4xf32>
    %41 = arith.addf %39, %40 : vector<8x4xf32>
    %42 = tpu.concatenate %38, %41 in 1 : vector<8x4xf32>, vector<8x4xf32> -> vector<8x8xf32>
    %43 = vector.extract_strided_slice %29 {offsets = [0, 0], sizes = [8, 8], strides = [1, 1]} : vector<8x32xf32> to vector<8x8xf32>
    %44 = vector.extract_strided_slice %43 {offsets = [0, 0], sizes = [8, 4], strides = [1, 1]} : vector<8x8xf32> to vector<8x4xf32>
    %45 = vector.extract_strided_slice %43 {offsets = [0, 4], sizes = [8, 4], strides = [1, 1]} : vector<8x8xf32> to vector<8x4xf32>
    %46 = arith.mulf %44, %4 : vector<8x4xf32>
    %47 = arith.mulf %45, %5 : vector<8x4xf32>
    %48 = arith.subf %46, %47 : vector<8x4xf32>
    %49 = arith.mulf %45, %4 : vector<8x4xf32>
    %50 = arith.mulf %44, %5 : vector<8x4xf32>
    %51 = arith.addf %49, %50 : vector<8x4xf32>
    %52 = tpu.concatenate %48, %51 in 1 : vector<8x4xf32>, vector<8x4xf32> -> vector<8x8xf32>
    %53 = vector.extract_strided_slice %32 {offsets = [0, 0], sizes = [8, 8], strides = [1, 1]} : vector<8x32xf32> to vector<8x8xf32>
    %54 = vector.extract_strided_slice %26 {offsets = [0, 8], sizes = [8, 8], strides = [1, 1]} : vector<8x32xf32> to vector<8x8xf32>
    %55 = vector.extract_strided_slice %54 {offsets = [0, 0], sizes = [8, 4], strides = [1, 1]} : vector<8x8xf32> to vector<8x4xf32>
    %56 = vector.extract_strided_slice %54 {offsets = [0, 4], sizes = [8, 4], strides = [1, 1]} : vector<8x8xf32> to vector<8x4xf32>
    %57 = arith.mulf %55, %4 : vector<8x4xf32>
    %58 = arith.mulf %56, %5 : vector<8x4xf32>
    %59 = arith.subf %57, %58 : vector<8x4xf32>
    %60 = arith.mulf %56, %4 : vector<8x4xf32>
    %61 = arith.mulf %55, %5 : vector<8x4xf32>
    %62 = arith.addf %60, %61 : vector<8x4xf32>
    %63 = tpu.concatenate %59, %62 in 1 : vector<8x4xf32>, vector<8x4xf32> -> vector<8x8xf32>
    %64 = vector.extract_strided_slice %29 {offsets = [0, 8], sizes = [8, 8], strides = [1, 1]} : vector<8x32xf32> to vector<8x8xf32>
    %65 = vector.extract_strided_slice %64 {offsets = [0, 0], sizes = [8, 4], strides = [1, 1]} : vector<8x8xf32> to vector<8x4xf32>
    %66 = vector.extract_strided_slice %64 {offsets = [0, 4], sizes = [8, 4], strides = [1, 1]} : vector<8x8xf32> to vector<8x4xf32>
    %67 = arith.mulf %65, %4 : vector<8x4xf32>
    %68 = arith.mulf %66, %5 : vector<8x4xf32>
    %69 = arith.subf %67, %68 : vector<8x4xf32>
    %70 = arith.mulf %66, %4 : vector<8x4xf32>
    %71 = arith.mulf %65, %5 : vector<8x4xf32>
    %72 = arith.addf %70, %71 : vector<8x4xf32>
    %73 = tpu.concatenate %69, %72 in 1 : vector<8x4xf32>, vector<8x4xf32> -> vector<8x8xf32>
    %74 = vector.extract_strided_slice %32 {offsets = [0, 8], sizes = [8, 8], strides = [1, 1]} : vector<8x32xf32> to vector<8x8xf32>
    %75 = vector.extract_strided_slice %26 {offsets = [0, 16], sizes = [8, 8], strides = [1, 1]} : vector<8x32xf32> to vector<8x8xf32>
    %76 = vector.extract_strided_slice %75 {offsets = [0, 0], sizes = [8, 4], strides = [1, 1]} : vector<8x8xf32> to vector<8x4xf32>
    %77 = vector.extract_strided_slice %75 {offsets = [0, 4], sizes = [8, 4], strides = [1, 1]} : vector<8x8xf32> to vector<8x4xf32>
    %78 = arith.mulf %76, %4 : vector<8x4xf32>
    %79 = arith.mulf %77, %5 : vector<8x4xf32>
    %80 = arith.subf %78, %79 : vector<8x4xf32>
    %81 = arith.mulf %77, %4 : vector<8x4xf32>
    %82 = arith.mulf %76, %5 : vector<8x4xf32>
    %83 = arith.addf %81, %82 : vector<8x4xf32>
    %84 = tpu.concatenate %80, %83 in 1 : vector<8x4xf32>, vector<8x4xf32> -> vector<8x8xf32>
    %85 = vector.extract_strided_slice %29 {offsets = [0, 16], sizes = [8, 8], strides = [1, 1]} : vector<8x32xf32> to vector<8x8xf32>
    %86 = vector.extract_strided_slice %85 {offsets = [0, 0], sizes = [8, 4], strides = [1, 1]} : vector<8x8xf32> to vector<8x4xf32>
    %87 = vector.extract_strided_slice %85 {offsets = [0, 4], sizes = [8, 4], strides = [1, 1]} : vector<8x8xf32> to vector<8x4xf32>
    %88 = arith.mulf %86, %4 : vector<8x4xf32>
    %89 = arith.mulf %87, %5 : vector<8x4xf32>
    %90 = arith.subf %88, %89 : vector<8x4xf32>
    %91 = arith.mulf %87, %4 : vector<8x4xf32>
    %92 = arith.mulf %86, %5 : vector<8x4xf32>
    %93 = arith.addf %91, %92 : vector<8x4xf32>
    %94 = tpu.concatenate %90, %93 in 1 : vector<8x4xf32>, vector<8x4xf32> -> vector<8x8xf32>
    %95 = vector.extract_strided_slice %32 {offsets = [0, 16], sizes = [8, 8], strides = [1, 1]} : vector<8x32xf32> to vector<8x8xf32>
    %96 = vector.extract_strided_slice %26 {offsets = [0, 24], sizes = [8, 8], strides = [1, 1]} : vector<8x32xf32> to vector<8x8xf32>
    %97 = vector.extract_strided_slice %96 {offsets = [0, 0], sizes = [8, 4], strides = [1, 1]} : vector<8x8xf32> to vector<8x4xf32>
    %98 = vector.extract_strided_slice %96 {offsets = [0, 4], sizes = [8, 4], strides = [1, 1]} : vector<8x8xf32> to vector<8x4xf32>
    %99 = arith.mulf %97, %4 : vector<8x4xf32>
    %100 = arith.mulf %98, %5 : vector<8x4xf32>
    %101 = arith.subf %99, %100 : vector<8x4xf32>
    %102 = arith.mulf %98, %4 : vector<8x4xf32>
    %103 = arith.mulf %97, %5 : vector<8x4xf32>
    %104 = arith.addf %102, %103 : vector<8x4xf32>
    %105 = tpu.concatenate %101, %104 in 1 : vector<8x4xf32>, vector<8x4xf32> -> vector<8x8xf32>
    %106 = vector.extract_strided_slice %29 {offsets = [0, 24], sizes = [8, 8], strides = [1, 1]} : vector<8x32xf32> to vector<8x8xf32>
    %107 = vector.extract_strided_slice %106 {offsets = [0, 0], sizes = [8, 4], strides = [1, 1]} : vector<8x8xf32> to vector<8x4xf32>
    %108 = vector.extract_strided_slice %106 {offsets = [0, 4], sizes = [8, 4], strides = [1, 1]} : vector<8x8xf32> to vector<8x4xf32>
    %109 = arith.mulf %107, %4 : vector<8x4xf32>
    %110 = arith.mulf %108, %5 : vector<8x4xf32>
    %111 = arith.subf %109, %110 : vector<8x4xf32>
    %112 = arith.mulf %108, %4 : vector<8x4xf32>
    %113 = arith.mulf %107, %5 : vector<8x4xf32>
    %114 = arith.addf %112, %113 : vector<8x4xf32>
    %115 = tpu.concatenate %111, %114 in 1 : vector<8x4xf32>, vector<8x4xf32> -> vector<8x8xf32>
    %116 = vector.extract_strided_slice %32 {offsets = [0, 24], sizes = [8, 8], strides = [1, 1]} : vector<8x32xf32> to vector<8x8xf32>
    %117 = vector.shape_cast %42 : vector<8x8xf32> to vector<1x8x8xf32>
    %118 = vector.shape_cast %63 : vector<8x8xf32> to vector<1x8x8xf32>
    %119 = vector.shape_cast %84 : vector<8x8xf32> to vector<1x8x8xf32>
    %120 = vector.shape_cast %105 : vector<8x8xf32> to vector<1x8x8xf32>
    %121 = tpu.concatenate %117, %118, %119, %120 in 0 : vector<1x8x8xf32>, vector<1x8x8xf32>, vector<1x8x8xf32>, vector<1x8x8xf32> -> vector<4x8x8xf32>
    %122 = arith.truncf %121 : vector<4x8x8xf32> to vector<4x8x8xbf16>
    %123 = vector.shape_cast %52 : vector<8x8xf32> to vector<1x8x8xf32>
    %124 = vector.shape_cast %73 : vector<8x8xf32> to vector<1x8x8xf32>
    %125 = vector.shape_cast %94 : vector<8x8xf32> to vector<1x8x8xf32>
    %126 = vector.shape_cast %115 : vector<8x8xf32> to vector<1x8x8xf32>
    %127 = tpu.concatenate %123, %124, %125, %126 in 0 : vector<1x8x8xf32>, vector<1x8x8xf32>, vector<1x8x8xf32>, vector<1x8x8xf32> -> vector<4x8x8xf32>
    %128 = arith.truncf %127 : vector<4x8x8xf32> to vector<4x8x8xbf16>
    %129 = vector.shape_cast %53 : vector<8x8xf32> to vector<1x8x8xf32>
    %130 = vector.shape_cast %74 : vector<8x8xf32> to vector<1x8x8xf32>
    %131 = vector.shape_cast %95 : vector<8x8xf32> to vector<1x8x8xf32>
    %132 = vector.shape_cast %116 : vector<8x8xf32> to vector<1x8x8xf32>
    %133 = tpu.concatenate %129, %130, %131, %132 in 0 : vector<1x8x8xf32>, vector<1x8x8xf32>, vector<1x8x8xf32>, vector<1x8x8xf32> -> vector<4x8x8xf32>
    %134 = arith.truncf %133 : vector<4x8x8xf32> to vector<4x8x8xbf16>
    "tpu.trace_start"() <{level = 10 : i32, message = "hsd,htd->hst"}> : () -> ()
    %cst_23 = arith.constant dense<0.000000e+00> : vector<4x8x8xf32>
    %135 = tpu.matmul %122, %128, %cst_23 {dimension_numbers = #tpu.dot_dimension_numbers<[2], [2], [1], [1], [0, 0, 0, 1, 1, 1], [0], [0]>} : vector<4x8x8xbf16>, vector<4x8x8xbf16>, vector<4x8x8xf32> -> vector<4x8x8xf32>
    %cst_24 = arith.constant -1.000000e+30 : f32
    "tpu.trace_stop"() : () -> ()
    %136 = vector.shape_cast %8 : vector<8x8xi1> to vector<1x8x8xi1>
    %137 = vector.broadcast %136 : vector<1x8x8xi1> to vector<4x8x8xi1>
    %138 = vector.broadcast %cst_24 : f32 to vector<4x8x8xf32>
    %139 = arith.select %137, %135, %138 : vector<4x8x8xi1>, vector<4x8x8xf32>
    %cst_25 = arith.constant dense<0xFF800000> : vector<4x8xf32>
    %140 = vector.multi_reduction <maximumf>, %139, %cst_25 [2] : vector<4x8x8xf32> to vector<4x8xf32>
    %141 = vector.shape_cast %140 : vector<4x8xf32> to vector<4x8x1xf32>
    %142 = vector.broadcast %141 : vector<4x8x1xf32> to vector<4x8x8xf32>
    %143 = arith.subf %139, %142 : vector<4x8x8xf32>
    %144 = math.exp %143 : vector<4x8x8xf32>
    %cst_26 = arith.constant dense<0.000000e+00> : vector<4x8xf32>
    %145 = vector.multi_reduction <add>, %144, %cst_26 [2] : vector<4x8x8xf32> to vector<4x8xf32>
    %146 = vector.shape_cast %145 : vector<4x8xf32> to vector<4x8x1xf32>
    %147 = tpu.reciprocal %146 {approx = true} : vector<4x8x1xf32> -> vector<4x8x1xf32>
    %148 = vector.broadcast %147 : vector<4x8x1xf32> to vector<4x8x8xf32>
    %149 = arith.mulf %144, %148 : vector<4x8x8xf32>
    %150 = arith.truncf %149 : vector<4x8x8xf32> to vector<4x8x8xbf16>
    "tpu.trace_start"() <{level = 10 : i32, message = "hst,htd->hsd"}> : () -> ()
    %cst_27 = arith.constant dense<0.000000e+00> : vector<4x8x8xf32>
    %151 = tpu.matmul %150, %134, %cst_27 {dimension_numbers = #tpu.dot_dimension_numbers<[2], [1], [1], [2], [0, 0, 0, 1, 1, 2], [0], [0]>} : vector<4x8x8xbf16>, vector<4x8x8xbf16>, vector<4x8x8xf32> -> vector<4x8x8xf32>
    "tpu.trace_stop"() : () -> ()
    %152 = vector.extract_strided_slice %151 {offsets = [0, 0, 0], sizes = [1, 8, 8], strides = [1, 1, 1]} : vector<4x8x8xf32> to vector<1x8x8xf32>
    %153 = vector.shape_cast %152 : vector<1x8x8xf32> to vector<8x8xf32>
    %154 = vector.extract_strided_slice %151 {offsets = [1, 0, 0], sizes = [1, 8, 8], strides = [1, 1, 1]} : vector<4x8x8xf32> to vector<1x8x8xf32>
    %155 = vector.shape_cast %154 : vector<1x8x8xf32> to vector<8x8xf32>
    %156 = vector.extract_strided_slice %151 {offsets = [2, 0, 0], sizes = [1, 8, 8], strides = [1, 1, 1]} : vector<4x8x8xf32> to vector<1x8x8xf32>
    %157 = vector.shape_cast %156 : vector<1x8x8xf32> to vector<8x8xf32>
    %158 = vector.extract_strided_slice %151 {offsets = [3, 0, 0], sizes = [1, 8, 8], strides = [1, 1, 1]} : vector<4x8x8xf32> to vector<1x8x8xf32>
    %159 = vector.shape_cast %158 : vector<1x8x8xf32> to vector<8x8xf32>
    %160 = tpu.concatenate %153, %155, %157, %159 in 1 : vector<8x8xf32>, vector<8x8xf32>, vector<8x8xf32>, vector<8x8xf32> -> vector<8x32xf32>
    %161 = arith.truncf %160 : vector<8x32xf32> to vector<8x32xbf16>
    %c0_28 = arith.constant 0 : index
    %c0_29 = arith.constant 0 : index
    %c0_30 = arith.constant 0 : index
    %162 = vector.load %arg8[%c0_28, %c0_29, %c0_30] : memref<1x32x32xbf16, #tpu.memory_space<vmem>>, vector<1x32x32xbf16>
    %163 = vector.shape_cast %162 : vector<1x32x32xbf16> to vector<32x32xbf16>
    %cst_31 = arith.constant dense<0.000000e+00> : vector<8x32xf32>
    %164 = tpu.matmul %161, %163, %cst_31 {dimension_numbers = #tpu.dot_dimension_numbers<[1], [0], [0], [1], [0, 0, 1, 1], [], []>} : vector<8x32xbf16>, vector<32x32xbf16>, vector<8x32xf32> -> vector<8x32xf32>
    %165 = arith.addf %3, %164 : vector<8x32xf32>
    %c0_32 = arith.constant 0 : index
    %c0_33 = arith.constant 0 : index
    %c0_34 = arith.constant 0 : index
    %166 = vector.load %arg4[%c0_32, %c0_33, %c0_34] : memref<1x1x32xf32, #tpu.memory_space<vmem>>, vector<1x1x32xf32>
    %167 = vector.shape_cast %166 : vector<1x1x32xf32> to vector<1x32xf32>
    %168 = arith.mulf %165, %165 : vector<8x32xf32>
    %cst_35 = arith.constant dense<0.000000e+00> : vector<8xf32>
    %169 = vector.multi_reduction <add>, %168, %cst_35 [1] : vector<8x32xf32> to vector<8xf32>
    %170 = vector.shape_cast %169 : vector<8xf32> to vector<8x1xf32>
    %cst_36 = arith.constant 3.200000e+01 : f32
    %171 = vector.broadcast %cst_36 : f32 to vector<8x1xf32>
    %172 = arith.divf %170, %171 : vector<8x1xf32>
    %cst_37 = arith.constant 9.99999997E-7 : f32
    %173 = vector.broadcast %cst_37 : f32 to vector<8x1xf32>
    %174 = arith.addf %172, %173 : vector<8x1xf32>
    %175 = math.rsqrt %174 : vector<8x1xf32>
    %176 = vector.broadcast %175 : vector<8x1xf32> to vector<8x32xf32>
    %177 = arith.mulf %165, %176 : vector<8x32xf32>
    %178 = vector.broadcast %167 : vector<1x32xf32> to vector<8x32xf32>
    %179 = arith.mulf %177, %178 : vector<8x32xf32>
    %180 = arith.truncf %179 : vector<8x32xf32> to vector<8x32xbf16>
    %c0_38 = arith.constant 0 : index
    %c0_39 = arith.constant 0 : index
    %c0_40 = arith.constant 0 : index
    %181 = vector.load %arg9[%c0_38, %c0_39, %c0_40] : memref<1x32x96xbf16, #tpu.memory_space<vmem>>, vector<1x32x96xbf16>
    %182 = vector.shape_cast %181 : vector<1x32x96xbf16> to vector<32x96xbf16>
    %cst_41 = arith.constant dense<0.000000e+00> : vector<8x96xf32>
    %183 = tpu.matmul %180, %182, %cst_41 {dimension_numbers = #tpu.dot_dimension_numbers<[1], [0], [0], [1], [0, 0, 1, 1], [], []>} : vector<8x32xbf16>, vector<32x96xbf16>, vector<8x96xf32> -> vector<8x96xf32>
    %c0_42 = arith.constant 0 : index
    %c0_43 = arith.constant 0 : index
    %c0_44 = arith.constant 0 : index
    %184 = vector.load %arg10[%c0_42, %c0_43, %c0_44] : memref<1x32x96xbf16, #tpu.memory_space<vmem>>, vector<1x32x96xbf16>
    %185 = vector.shape_cast %184 : vector<1x32x96xbf16> to vector<32x96xbf16>
    %cst_45 = arith.constant dense<0.000000e+00> : vector<8x96xf32>
    %186 = tpu.matmul %180, %185, %cst_45 {dimension_numbers = #tpu.dot_dimension_numbers<[1], [0], [0], [1], [0, 0, 1, 1], [], []>} : vector<8x32xbf16>, vector<32x96xbf16>, vector<8x96xf32> -> vector<8x96xf32>
    %187 = arith.negf %186 : vector<8x96xf32>
    %188 = math.exp %187 : vector<8x96xf32>
    %cst_46 = arith.constant 1.000000e+00 : f32
    %189 = vector.broadcast %cst_46 : f32 to vector<8x96xf32>
    %190 = arith.addf %189, %188 : vector<8x96xf32>
    %191 = arith.divf %189, %190 : vector<8x96xf32>
    %192 = arith.mulf %186, %191 : vector<8x96xf32>
    %193 = arith.mulf %183, %192 : vector<8x96xf32>
    %194 = arith.truncf %193 : vector<8x96xf32> to vector<8x96xbf16>
    %c0_47 = arith.constant 0 : index
    %c0_48 = arith.constant 0 : index
    %c0_49 = arith.constant 0 : index
    %195 = vector.load %arg11[%c0_47, %c0_48, %c0_49] : memref<1x96x32xbf16, #tpu.memory_space<vmem>>, vector<1x96x32xbf16>
    %196 = vector.shape_cast %195 : vector<1x96x32xbf16> to vector<96x32xbf16>
    %cst_50 = arith.constant dense<0.000000e+00> : vector<8x32xf32>
    %197 = tpu.matmul %194, %196, %cst_50 {dimension_numbers = #tpu.dot_dimension_numbers<[1], [0], [0], [1], [0, 0, 1, 1], [], []>} : vector<8x96xbf16>, vector<96x32xbf16>, vector<8x32xf32> -> vector<8x32xf32>
    %198 = arith.addf %165, %197 : vector<8x32xf32>
    %c0_51 = arith.constant 0 : index
    %c0_52 = arith.constant 0 : index
    %199 = vector.load %arg16[%c0_51, %c0_52] : memref<8x32xf32, #tpu.memory_space<vmem>>, vector<8x32xf32>
    tpu.vector_store %arg16[%c0_51, %c0_52], %198 {strides = array<i32>} : memref<8x32xf32, #tpu.memory_space<vmem>>, vector<8x32xf32>,
    %c1_i32 = arith.constant 1 : i32
    %200 = arith.cmpi eq, %arg1, %c1_i32 : i32
    %201 = arith.extui %200 : i1 to i32
    %c0_i32_53 = arith.constant 0 : i32
    %202 = arith.cmpi ne, %201, %c0_i32_53 : i32
    scf.if %202 {
      %c0_54 = arith.constant 0 : index
      %c0_55 = arith.constant 0 : index
      %203 = vector.load %arg12[%c0_54, %c0_55] : memref<1x32xf32, #tpu.memory_space<vmem>>, vector<1x32xf32>
      %204 = arith.mulf %198, %198 : vector<8x32xf32>
      %cst_56 = arith.constant dense<0.000000e+00> : vector<8xf32>
      %205 = vector.multi_reduction <add>, %204, %cst_56 [1] : vector<8x32xf32> to vector<8xf32>
      %206 = vector.shape_cast %205 : vector<8xf32> to vector<8x1xf32>
      %cst_57 = arith.constant 3.200000e+01 : f32
      %207 = vector.broadcast %cst_57 : f32 to vector<8x1xf32>
      %208 = arith.divf %206, %207 : vector<8x1xf32>
      %cst_58 = arith.constant 9.99999997E-7 : f32
      %209 = vector.broadcast %cst_58 : f32 to vector<8x1xf32>
      %210 = arith.addf %208, %209 : vector<8x1xf32>
      %211 = math.rsqrt %210 : vector<8x1xf32>
      %212 = vector.broadcast %211 : vector<8x1xf32> to vector<8x32xf32>
      %213 = arith.mulf %198, %212 : vector<8x32xf32>
      %214 = vector.broadcast %203 : vector<1x32xf32> to vector<8x32xf32>
      %215 = arith.mulf %213, %214 : vector<8x32xf32>
      %c0_59 = arith.constant 0 : index
      %c0_60 = arith.constant 0 : index
      %c0_61 = arith.constant 0 : index
      %216 = vector.load %arg15[%c0_59, %c0_60, %c0_61] : memref<1x8x32xf32, #tpu.memory_space<vmem>>, vector<1x8x32xf32>
      %217 = vector.shape_cast %216 : vector<1x8x32xf32> to vector<8x32xf32>
      %218 = vector.shape_cast %215 : vector<8x32xf32> to vector<1x8x32xf32>
      tpu.vector_store %arg15[%c0_59, %c0_60, %c0_61], %218 {strides = array<i32>} : memref<1x8x32xf32, #tpu.memory_space<vmem>>, vector<1x8x32xf32>,
    } else {
    }
    return
  }
  func.func @transform_0(%arg0: i32, %arg1: i32) -> (i32, i32, i32) {
    %c0_i32 = arith.constant 0 : i32
    %c0_i32_0 = arith.constant 0 : i32
    %c0_i32_1 = arith.constant 0 : i32
    return %arg0, %c0_i32, %c0_i32_0 : i32, i32, i32
  }
  func.func @transform_1(%arg0: i32, %arg1: i32) -> (i32, i32, i32) {
    %c0_i32 = arith.constant 0 : i32
    %c0_i32_0 = arith.constant 0 : i32
    %c0_i32_1 = arith.constant 0 : i32
    return %arg1, %c0_i32, %c0_i32_0 : i32, i32, i32
  }
  func.func @transform_2(%arg0: i32, %arg1: i32) -> (i32, i32, i32) {
    %c0_i32 = arith.constant 0 : i32
    %c0_i32_0 = arith.constant 0 : i32
    %c0_i32_1 = arith.constant 0 : i32
    return %arg1, %c0_i32, %c0_i32_0 : i32, i32, i32
  }
  func.func @transform_3(%arg0: i32, %arg1: i32) -> (i32, i32, i32) {
    %c0_i32 = arith.constant 0 : i32
    %c0_i32_0 = arith.constant 0 : i32
    %c0_i32_1 = arith.constant 0 : i32
    return %arg1, %c0_i32, %c0_i32_0 : i32, i32, i32
  }
  func.func @transform_4(%arg0: i32, %arg1: i32) -> (i32, i32, i32) {
    %c0_i32 = arith.constant 0 : i32
    %c0_i32_0 = arith.constant 0 : i32
    %c0_i32_1 = arith.constant 0 : i32
    return %arg1, %c0_i32, %c0_i32_0 : i32, i32, i32
  }
  func.func @transform_5(%arg0: i32, %arg1: i32) -> (i32, i32, i32) {
    %c0_i32 = arith.constant 0 : i32
    %c0_i32_0 = arith.constant 0 : i32
    %c0_i32_1 = arith.constant 0 : i32
    return %arg1, %c0_i32, %c0_i32_0 : i32, i32, i32
  }
  func.func @transform_6(%arg0: i32, %arg1: i32) -> (i32, i32, i32) {
    %c0_i32 = arith.constant 0 : i32
    %c0_i32_0 = arith.constant 0 : i32
    %c0_i32_1 = arith.constant 0 : i32
    return %arg1, %c0_i32, %c0_i32_0 : i32, i32, i32
  }
  func.func @transform_7(%arg0: i32, %arg1: i32) -> (i32, i32, i32) {
    %c0_i32 = arith.constant 0 : i32
    %c0_i32_0 = arith.constant 0 : i32
    %c0_i32_1 = arith.constant 0 : i32
    return %arg1, %c0_i32, %c0_i32_0 : i32, i32, i32
  }
  func.func @transform_8(%arg0: i32, %arg1: i32) -> (i32, i32, i32) {
    %c0_i32 = arith.constant 0 : i32
    %c0_i32_0 = arith.constant 0 : i32
    %c0_i32_1 = arith.constant 0 : i32
    return %arg1, %c0_i32, %c0_i32_0 : i32, i32, i32
  }
  func.func @transform_9(%arg0: i32, %arg1: i32) -> (i32, i32, i32) {
    %c0_i32 = arith.constant 0 : i32
    %c0_i32_0 = arith.constant 0 : i32
    %c0_i32_1 = arith.constant 0 : i32
    return %arg1, %c0_i32, %c0_i32_0 : i32, i32, i32
  }
  func.func @transform_10(%arg0: i32, %arg1: i32) -> (i32, i32) {
    %c0_i32 = arith.constant 0 : i32
    %c0_i32_0 = arith.constant 0 : i32
    %c0_i32_1 = arith.constant 0 : i32
    return %c0_i32, %c0_i32_0 : i32, i32
  }
  func.func @transform_11(%arg0: i32, %arg1: i32) -> (i32, i32) {
    %c0_i32 = arith.constant 0 : i32
    %c0_i32_0 = arith.constant 0 : i32
    %c0_i32_1 = arith.constant 0 : i32
    return %c0_i32, %c0_i32_0 : i32, i32
  }
  func.func @transform_12(%arg0: i32, %arg1: i32) -> (i32, i32) {
    %c0_i32 = arith.constant 0 : i32
    %c0_i32_0 = arith.constant 0 : i32
    %c0_i32_1 = arith.constant 0 : i32
    return %c0_i32, %c0_i32_0 : i32, i32
  }
  func.func @transform_13(%arg0: i32, %arg1: i32) -> (i32, i32, i32) {
    %c0_i32 = arith.constant 0 : i32
    %c0_i32_0 = arith.constant 0 : i32
    %c0_i32_1 = arith.constant 0 : i32
    return %arg0, %c0_i32, %c0_i32_0 : i32, i32, i32
  }
}

</mosaic_0001>

<bundles_post_ra>
// kernel: tpu_custom_call.1
= control target key start
LH: loop header
LB: loop body
LE: loop exit
PB: predicated region body
PF: predicated region fallthrough
CT: control target
= control target key end

     0   :  { %s3545_s0 = inlined_call_operand.hbm [shape: f32[2,8,32], index: 0, kind: input, shape index: {}]   ;;  %s3546_s1 = inlined_call_operand.vmem [shape: f32[2,1,32], index: 1, kind: input, shape index: {}]   ;;  %s3547_s2 = inlined_call_operand.hbm [shape: f32[2,1,32], index: 2, kind: input, shape index: {}]   ;;  %s3548_s3 = inlined_call_operand.vmem [shape: bf16[2,32,32], index: 3, kind: input, shape index: {}]   ;;  %s3549_s4 = inlined_call_operand.vmem [shape: bf16[2,32,32], index: 4, kind: input, shape index: {}]   ;;  %s3550_s5 = inlined_call_operand.vmem [shape: bf16[2,32,32], index: 5, kind: input, shape index: {}]   ;;  %s3551_s6 = inlined_call_operand.vmem [shape: bf16[2,32,32], index: 6, kind: input, shape index: {}]   ;;  %s3552_s7 = inlined_call_operand.hbm [shape: bf16[2,32,96], index: 7, kind: input, shape index: {}]   ;;  %s3553_s8 = inlined_call_operand.hbm [shape: bf16[2,32,96], index: 8, kind: input, shape index: {}]   ;;  %s3554_s9 = inlined_call_operand.vmem [shape: bf16[2,96,32], index: 9, kind: input, shape index: {}]   ;;  %s3555_s10 = inlined_call_operand.hbm [shape: f32[1,32], index: 10, kind: input, shape index: {}]   ;;  %s3556_s11 = inlined_call_operand.vmem [shape: f32[8,4], index: 11, kind: input, shape index: {}]   ;;  %s3557_s12 = inlined_call_operand.vmem [shape: f32[8,4], index: 12, kind: input, shape index: {}]   ;;  %s3558_s13 = inlined_call_operand.hbm [shape: f32[2,8,32], index: 13, kind: output, shape index: {}]  }
   0x1   :  { %3578 = sst [smem:[#allocation31_spill]] %s3545_s0 }
   0x2   :  { %3579 = sst [smem:[#allocation32_spill]] %s3546_s1 }
   0x3   :  { %3580 = sst [smem:[#allocation33_spill]] %s3547_s2 }
   0x4   :  { %3581 = sst [smem:[#allocation34_spill]] %s3548_s3 }
   0x5   :  { %3582 = sst [smem:[#allocation35_spill]] %s3549_s4 }
   0x6   :  { %3583 = sst [smem:[#allocation36_spill]] %s3550_s5 }
   0x7   :  { %3584 = sst [smem:[#allocation37_spill]] %s3551_s6 }
   0x8   :  { %3585 = sst [smem:[#allocation38_spill]] %s3552_s7 }
   0x9   :  { %3586 = sst [smem:[#allocation39_spill]] %s3553_s8 }
   0xa   :  { %3587 = sst [smem:[#allocation40_spill]] %s3554_s9 }
   0xb   :  { %3588 = sst [smem:[#allocation41_spill]] %s3555_s10 }
   0xc   :  { %3589 = sst [smem:[#allocation42_spill]] %s3556_s11 }
   0xd   :  { %3590 = sst [smem:[#allocation43_spill]] %s3557_s12 }
   0xe   :  { %3591 = sst [smem:[#allocation44_spill]] %s3558_s13 }
   0xf   :  { %18 = vsyncpa [#allocation4], 0 }
  0x10   :  { %20 = vsyncpa [#allocation4 + $0x1], 0 }
  0x11   :  { %21 = vsyncpa [#allocation7], 0 }
  0x12   :  { %23 = vsyncpa [#allocation7 + $0x1], 0 }
  0x13   :  { %24 = vsyncpa [#allocation10], 0 }
  0x14   :  { %26 = vsyncpa [#allocation10 + $0x1], 0 }
  0x15   :  { %27 = vsyncpa [#allocation5], 0 }
  0x16   :  { %29 = vsyncpa [#allocation5 + $0x1], 0  ;;  %s2952_s25 = smov 0   ;;  %s2954_s26 = smov 0  }
  0x17   :  { %s2956_s27 = smov 0   ;;  %s2958_s28 = smov 0  }
  0x18   :  { %s2960_s29 = smov 0   ;;  %s2962_s30 = smov 0  }
  0x19   :  { %s2964_s14 = smov 0   ;;  %s2966_s15 = smov 0  }
  0x1a   :  { %s2968_s16 = smov 0   ;;  %s2970_s17 = smov 0  }
  0x1b   :  { %s2972_s18 = smov 0  }
  0x1c LB: > { %3592 = sst [smem:[#allocation18_spill]] %s2823_s26  ;;  %s3006_s19 = sadd.s32 4294967295, %s2859_s18   ;;  %s2859_s18 = sphi %s2972_s18, %s35_s18   ;;  %s2855_s17 = sphi %s2970_s17, %s3661_s17   ;;  %s2851_s16 = sphi %s2968_s16, %s3660_s16   ;;  %s2847_s15 = sphi %s2966_s15, %s3659_s15   ;;  %s2843_s14 = sphi %s2964_s14, %s3658_s14   ;;  %s2839_s30 = sphi %s2962_s30, %s3664_s30   ;;  %s2835_s29 = sphi %s2960_s29, %s3663_s29   ;;  %s2831_s28 = sphi %s2958_s28, %s3662_s28   ;;  %s2827_s27 = sphi %s2956_s27, %s3657_s27   ;;  %s2823_s26 = sphi %s2954_s26, %s3656_s26   ;;  %s2819_s25 = sphi %s2952_s25, %s3655_s25  }
  0x1d   : > { %3593 = sst [smem:[#allocation19_spill]] %s2827_s27  ;;  %s2141_s20 = sadd.s32 4294967294, %s2859_s18  }
  0x1e   : > { %3594 = sst [smem:[#allocation20_spill]] %s2831_s28  ;;  %p67_p0 = scmp.ne.s32.totalorder %s2835_s29, %s2831_s28 }
  0x1f   : > { %3595 = sst [smem:[#allocation21_spill]] %s2843_s14  ;;  %p3562_p1 = scmp.eq.s32.totalorder %s3006_s19, 0 }
  0x20   : > { %3596 = sst [smem:[#allocation22_spill]] %s2847_s15  ;;  %p119_p2 = scmp.ne.s32.totalorder %s2823_s26, %s2819_s25 }
  0x21   : > { %3597 = sst [smem:[#allocation23_spill]] %s2851_s16  ;;  %p3016_p4 = por %p3562_p1, %p67_p0 }
  0x22   : > { %3598 = sst [smem:[#allocation24_spill]] %s2855_s17  ;;  %p394_p5 = scmp.eq.s32.totalorder %s2141_s20, 3 }
  0x23   : > { %p3022_p6 = por %p119_p2, %p3562_p1  ;;  %p2142_p7 = scmp.ge.s32.totalorder %s2859_s18, 1 }
  0x24   : > { %p3027_p8 = por %p394_p5, %p67_p0  ;;  %p401_p9 = scmp.lt.s32.totalorder %s2859_s18, 5 }
  0x25   : > { %s3600_s22 = scalar_select %p3022_p6, 1, 0 }
  0x26   : > { %s3602_s23 = scalar_select %p3027_p8, 1, 0 }
  0x27   : > { %3601 = sst [smem:[#allocation25_spill]] %s3600_s22  ;;  %p3032_p10 = pnand %p2142_p7, %p401_p9 }
  0x28   : > { %3603 = sst [smem:[#allocation26_spill]] %s3602_s23  ;;  %s2861_s25 = smov [#allocation11]  }
  0x29   : > { %s414_s28 = sshll.u32 %s2861_s25, 4  ;;  %p2386_p11 = pneg %p3032_p10  ;;  %s415_s28 = int_to_ptr.vmem [resolvable:$true] %s414_s28 }
  0x2a   : > { %s44_s13 = sadd.s32 1, %s2851_s16  ;;  %p62_p13 = scmp.eq.s32.totalorder %s2859_s18, 0 }
  0x2b   : > { %p3040_p12 = pnand %p2386_p11, %p3562_p1  ;;  %p3046_p0 = scmp.ge.s32.totalorder %s44_s13, 2 }
  0x2c   : > { %s2600_s15 = scalar_lea.vmem %s415_s28, 16  ;;  %s2607_s25 = scalar_lea.vmem %s415_s28, 32 }
  0x2d   : > { %p2591_p2 = pneg %p3040_p12  ;;  %p2601_p5 = scmp.ne.s32.totalorder %s415_s28, %s2600_s15 }
  0x2e   : > { %p2608_p3 = scmp.lt.s32.totalorder %s415_s28, %s415_s28  ;;  %p2609_p8 = scmp.lt.s32.totalorder %s2607_s25, %s2600_s15 }
  0x2f   : > { %p2603_p7 = pnand %p2601_p5, %p2591_p2 }
  0x30   : > { %p2610_p11 = por %p2609_p8, %p2608_p3 }
  0x31   : > { %p2604_p9 = pneg %p2603_p7 }
  0x33   : > { %p2611_p1 = pnand %p2610_p11, %p2604_p9 }
  0x35   : > { %2614 = shalt.err (!%p2611_p1)
}
  0x36   : > { %s3607_s10 = sld [smem:[#allocation41_spill]]  ;;  %s3666_s13 = smov (%p3046_p0, %s44_s13), 0 }
  0x37   : > { %3608 = sst [smem:[#allocation27_spill]] %s3666_s13  ;;  %s106_s15 = sadd.s32 1, %s2827_s27 }
  0x38   : > { %p113_p1 = scmp.ne.s32.totalorder %s2827_s27, %s2823_s26  ;;  %s103_s11 = ssub.s32 %s2851_s16, %s3666_s13 }
  0x39   : > { %p3565_p3 = scmp.lt.s32.totalorder %s2859_s18, 4  ;;  %p104_p8 = scmp.eq.s32.totalorder %s103_s11, 0 }
  0x3a   : > { %p115_p2 = por %p113_p1, %p62_p13  ;;  %s457_s20 = sand.u32 1, %s2827_s27  }
  0x3b   : > { %s3072_s25 = scalar_select %p104_p8, %s2827_s27, %s106_s15  }
  0x3c   : > { %2389 = dma.hbm_to_vmem [thread:$0]  (!%p3040_p12), %s3607_s10, 16, %s415_s28, [#allocation10]  }
  0x3d   : > { %3609 = sst [smem:[#allocation28_spill]] %s3072_s25  ;;  %s2147_s9 = sshll.u32 %s2851_s16, 4 }
  0x3e   : > { %s458_s28 = scalar_lea.vmem [#allocation6], %s457_s20  ;;  %s3610_s2 = sld [smem:[#allocation33_spill]] }
  0x3f   : > { %s465_s10 = sshll.u32 %s458_s28, 4  ;;  %p3080_p12 = pnand %p3565_p3, %p115_p2  ;;  %s466_s10 = int_to_ptr.vmem [resolvable:$true] %s465_s10 }
  0x40   : > { %s2148_s11 = sshll.u32 %s457_s20, 4  ;;  %s3612_s25 = sand.u32 1, %s2859_s18  }
  0x41   : > { %s508_s3 = scalar_lea.vmem [#allocation8], %s2148_s11  ;;  %s3087_s27 = scalar_lea.sflag [#allocation7], %s3612_s25 }
  0x42   : > { %s515_s15 = sshll.u32 %s508_s3, 4  ;;  %p3573_p5 = pneg %p3080_p12  ;;  %s3097_s15 = int_to_ptr.vmem [resolvable:$true] %s515_s15 }
  0x43   : > { %s2628_s28 = scalar_lea.vmem %s466_s10, 16  ;;  %s2862_s5 = smov [#allocation6]  }
  0x44   : > { %s463_s4 = scalar_lea.hbm %s3610_s2, %s2147_s9  ;;  %p2629_p7 = scmp.ne.s32.totalorder %s466_s10, %s2628_s28 }
  0x45   : > { %s2633_s6 = sshll.u32 %s2862_s5, 4  ;;  %s2634_s6 = int_to_ptr.vmem [resolvable:$false] %s2633_s6 }
  0x46   : > { %p2631_p9 = pnand %p2629_p7, %p3573_p5  ;;  %s2635_s9 = scalar_lea.vmem %s2634_s6, 32 }
  0x47   : > { %p2636_p1 = scmp.lt.s32.totalorder %s466_s10, %s2634_s6  ;;  %p2637_p8 = scmp.lt.s32.totalorder %s2635_s9, %s2628_s28 }
  0x48   : > { %p2632_p11 = pneg %p2631_p9 }
  0x49   : > { %p2638_p2 = por %p2637_p8, %p2636_p1 }
  0x4b   : > { %p2639_p3 = pnand %p2638_p2, %p2632_p11 }
  0x4d   : > { %2642 = shalt.err (!%p2639_p3)
}
  0x4e   : > { %2396 = dma.hbm_to_vmem [thread:$0]  (!%p3080_p12), %s463_s4, 16, %s466_s10, %s3087_s27  }
  0x4f   : > { %s529_s3 = scalar_lea.vmem [#allocation9], %s2148_s11  ;;  %s47_s25 = sadd.s32 1, %s2855_s17 }
  0x50   : > { %s536_s20 = sshll.u32 %s529_s3, 4  ;;  %s3668_s25 = smov (!%p3046_p0, %s47_s25), %s2855_s17  ;;  %s3099_s20 = int_to_ptr.vmem [resolvable:$true] %s536_s20 }
  0x51   : > { %s54_s28 = sadd.s32 1, %s2839_s30  ;;  %p61_p3 = scmp.ne.s32.totalorder %s2839_s30, %s2835_s29 }
  0x52   : > { %p49_p7 = scmp.ge.s32.totalorder %s3668_s25, 2  ;;  %s431_s5 = sand.u32 1, %s2839_s30  }
  0x53   : > { %p63_p9 = por %p62_p13, %p61_p3  ;;  %p3613_p11 = scmp.eq.s32.totalorder %s3006_s19, 3 }
  0x54   : > { %s3670_s25 = smov (%p49_p7, %s3668_s25), 0  ;;  %s2145_s10 = sshll.u32 %s431_s5, 3 }
  0x55   : > { %p3113_p1 = por %p3613_p11, %p61_p3  ;;  %3616 = sst [smem:[#allocation30_spill]] %s3670_s25 }
  0x56   : > { %s51_s23 = ssub.s32 %s2855_s17, %s3670_s25  ;;  %s2146_s11 = sshll.u32 %s2855_s17, 7 }
  0x57   : > { %s3614_s4 = scalar_select %p3113_p1, 1, 0 }
  0x58   : > { %p52_p8 = scmp.eq.s32.totalorder %s51_s23, 0  ;;  %s3617_s0 = sld [smem:[#allocation31_spill]] }
  0x59   : > { %3615 = sst [smem:[#allocation29_spill]] %s3614_s4  ;;  %s435_s12 = scalar_lea.vmem [#allocation3], %s2145_s10 }
  0x5a   : > { %s442_s2 = sshll.u32 %s435_s12, 4  ;;  %p3618_p13 = scmp.lt.s32.totalorder %s2859_s18, 4  ;;  %s443_s2 = int_to_ptr.vmem [resolvable:$true] %s442_s2 }
  0x5b   : > { %s3126_s1 = scalar_select %p52_p8, %s2839_s30, %s54_s28  }
  0x5c   : > { %p3130_p0 = pnand %p3618_p13, %p63_p9  ;;  %s3620_s4 = sshll.u32 %s2851_s16, 8 }
  0x5d   : > { %s3621_s7 = sld [smem:[#allocation38_spill]]  ;;  %s432_s25 = scalar_lea.sflag [#allocation4], %s431_s5 }
  0x5e   : > { %s440_s3 = scalar_lea.hbm %s3617_s0, %s2146_s11  ;;  %p2645_p2 = pneg %p3130_p0 }
  0x5f   : > { %s2656_s10 = scalar_lea.vmem %s443_s2, 128  ;;  %s2863_s12 = smov [#allocation3]  }
  0x60   : > { %p2657_p3 = scmp.ne.s32.totalorder %s443_s2, %s2656_s10  ;;  %s2661_s28 = sshll.u32 %s2863_s12, 4  ;;  %s2662_s28 = int_to_ptr.vmem [resolvable:$false] %s2661_s28 }
  0x61   : > { %s2663_s11 = scalar_lea.vmem %s2662_s28, 256  ;;  %p2664_p9 = scmp.lt.s32.totalorder %s443_s2, %s2662_s28 }
  0x62   : > { %p2659_p7 = pnand %p2657_p3, %p2645_p2  ;;  %p2665_p8 = scmp.lt.s32.totalorder %s2663_s11, %s2656_s10 }
  0x63   : > { %s3139_s23 = scalar_lea.hbm %s3621_s7, %s3620_s4 }
  0x64   : > { %p2660_p11 = pneg %p2659_p7  ;;  %p2666_p13 = por %p2665_p8, %p2664_p9 }
  0x66   : > { %p2667_p5 = pnand %p2666_p13, %p2660_p11 }
  0x68   : > { %2670 = shalt.err (!%p2667_p5)
}
  0x69   : > { %2393 = dma.hbm_to_vmem [thread:$0]  (!%p3130_p0), %s440_s3, 128, %s443_s2, %s432_s25  }
  0x6a   : > { %s2684_s26 = scalar_lea.vmem %s3097_s15, 256  ;;  %p3622_p2 = pneg %p3080_p12 }
  0x6b   : > { %p2685_p1 = scmp.ne.s32.totalorder %s3097_s15, %s2684_s26  ;;  %s2864_s22 = smov [#allocation8]  }
  0x6c   : > { %s2689_s5 = sshll.u32 %s2864_s22, 4  ;;  %s2690_s5 = int_to_ptr.vmem [resolvable:$false] %s2689_s5 }
  0x6d   : > { %p2687_p3 = pnand %p2685_p1, %p3622_p2  ;;  %s2691_s4 = scalar_lea.vmem %s2690_s5, 512 }
  0x6e   : > { %p2692_p9 = scmp.lt.s32.totalorder %s3097_s15, %s2690_s5  ;;  %p2693_p11 = scmp.lt.s32.totalorder %s2691_s4, %s2684_s26 }
  0x6f   : > { %p2688_p7 = pneg %p2687_p3 }
  0x70   : > { %p2694_p5 = por %p2693_p11, %p2692_p9 }
  0x72   : > { %p2695_p8 = pnand %p2694_p5, %p2688_p7 }
  0x74   : > { %2698 = shalt.err (!%p2695_p8)
}
  0x75   : > { %s2865_s14 = smov 64   ;;  %s2866_s2 = smov 4  }
  0x76   : > { %2399 = dma.hbm_to_vmem [thread:$0]  (!%p3080_p12), %s3139_s23, 256, %s3097_s15, %s3087_s27, %s2865_s14, %s2865_s14, %s2866_s2  }
  0x77   : > { %s3623_s25 = sshll.u32 %s2851_s16, 8  ;;  %s3624_s8 = sld [smem:[#allocation39_spill]] }
  0x78   : > { %s3625_s10 = sand.u32 1, %s2859_s18   ;;  %s2712_s28 = scalar_lea.vmem %s3099_s20, 256 }
  0x79   : > { %s526_s12 = scalar_lea.sflag [#allocation10], %s3625_s10  ;;  %p2713_p1 = scmp.ne.s32.totalorder %s3099_s20, %s2712_s28 }
  0x7a   : > { %p3626_p0 = pmov %p3622_p2  ;;  %s2867_s11 = smov [#allocation9]  }
  0x7b   : > { %s2717_s26 = sshll.u32 %s2867_s11, 4  ;;  %s2718_s26 = int_to_ptr.vmem [resolvable:$false] %s2717_s26 }
  0x7c   : > { %p2715_p13 = pnand %p2713_p1, %p3626_p0  ;;  %s2719_s22 = scalar_lea.vmem %s2718_s26, 512 }
  0x7d   : > { %s535_s3 = scalar_lea.hbm %s3624_s8, %s3623_s25  ;;  %p2720_p3 = scmp.lt.s32.totalorder %s3099_s20, %s2718_s26 }
  0x7e   : > { %p2716_p2 = pneg %p2715_p13  ;;  %p2721_p7 = scmp.lt.s32.totalorder %s2719_s22, %s2712_s28 }
  0x80   : > { %p2722_p9 = por %p2721_p7, %p2720_p3 }
  0x82   : > { %p2723_p11 = pnand %p2722_p9, %p2716_p2 }
  0x84   : > { %2726 = shalt.err (!%p2723_p11)
}
  0x85   : > { %2402 = dma.hbm_to_vmem [thread:$0]  (!%p3080_p12), %s535_s3, 256, %s3099_s20, %s526_s12, %s2865_s14, %s2865_s14, %s2866_s2  }
  0x86   : > { %556 = sbr.rel (%p3032_p10) target bundleno = 2600 (0xa28), region = 72  ;;  %s3175_s27 = sand.u32 (!%p3032_p10), 1, %s2835_s29  }
  0x87   : > { %s3575_s15 = sshll.u32 (!%p3032_p10), %s3175_s27, 3  ;;  %s559_s23 = scalar_lea.sflag (!%p3032_p10), [#allocation4], %s3175_s27 }
  0x88   : > { %s562_s5 = scalar_lea.vmem (!%p3032_p10), [#allocation3], %s3575_s15 }
  0x8b   : > { %2798 = dma.done.wait (%p3016_p4), %s559_s23, 128  }
  0x8c   : > { %2800 = vsyncadd (%p3016_p4), %s559_s23, 4294967168  ;;  %s3627_s13 = sld [smem:[#allocation18_spill]]  ;;  %s567_s20 = sand.u32 1, %s3006_s19  }
  0x8d   : > { %s568_s14 = scalar_lea.sflag [#allocation7], %s567_s20 }
  0x92   : > { %s569_s4 = sand.u32 1, %s3627_s13  }
  0x93   : > { %s3187_s2 = scalar_lea.vmem [#allocation6], %s569_s4 }
  0x94   : > { %2802 = dma.done.wait (%p3022_p6), %s568_s14, 272  }
  0x95   : > { %2804 = vsyncadd (%p3022_p6), %s568_s14, 4294967024  ;;  %s3193_s25 = sshll.u32 %s569_s4, 4  ;;  %s585_s6 = scalar_lea.sflag [#allocation10], %s567_s20 }
  0x96   : > { %2806 = dma.done.wait (%p3022_p6), %s585_s6, 256  }
  0x97   : > { %2808 = vsyncadd (%p3022_p6), %s585_s6, 4294967040  ;;  %p3629_p4 = scmp.eq.s32.totalorder %s3006_s19, 0 }
  0x99   : > { %2810 = dma.done.wait (%p3629_p4), [#allocation10], 16   ;;  %p3630_p10 = pmov %p3629_p4 }
  0x9a   : > { %s3631_s3 = sld [smem:[#allocation21_spill]]  ;;  %s3638_s13 = sshll.u32 %s3175_s27, 3 }
  0x9b   : > { %2812 = vsyncadd (%p3630_p10), [#allocation10], 4294967280  ;;  %s3633_s24 = sld [smem:[#allocation34_spill]] }
  0x9c   : > { %s3634_s14 = sld [smem:[#allocation35_spill]] }
  0x9d   : > { %s3635_s15 = sld [smem:[#allocation36_spill]] }
  0x9e   : > { %s3636_s12 = sld [smem:[#allocation37_spill]] }
  0x9f   : > { %s3637_s16 = sld [smem:[#allocation40_spill]] }
  0xa0   : > { %p677_p12 = scmp.lt.s32.totalorder %s3631_s3, 1  ;;  %p2169_p6 = scmp.ne.s32.totalorder %s3631_s3, 0 }
  0xa2   : > { %s3207_s10 = scalar_select %p677_p12, %s3631_s3, 1 }
  0xa3   : > { %709 = sbr.rel (%p2169_p6) target bundleno = 170 (0xaa), region = 96 }
  0xa4   : > { %s2214_s22 = sshll.u32 %s3207_s10, 4  ;;  %s2371_s11 = smul.u32 48, %s3207_s10 }
  0xa5   : > { %s684_s20 = scalar_lea.vmem %s3633_s24, %s2214_s22  ;;  %s3220_s6 = scalar_lea.vmem %s3634_s14, %s2214_s22 }
  0xa6   : > { %s694_s0 = scalar_lea.vmem %s3635_s15, %s2214_s22  ;;  %s3228_s28 = scalar_lea.vmem %s3636_s12, %s2214_s22 }
  0xa7   : > { %s3234_s23 = scalar_lea.vmem %s3637_s16, %s2371_s11  ;;  %s3238_s24 = scalar_lea.vmem [#allocation12], %s3638_s13 }
  0xa8   : > { %v710_v0 = vld [vmem:[%s562_s5] sm:$0xff]  ;;  %vm711_vm0 = vcmask 261120  }
  0xa9   : > { %712 = vst.msk [vmem:[#allocation2] sm:$0xff] %vm711_vm0, %v710_v0 }
  0xaa PF: > { %vm723_vm1 = vcmask 261120   ;;  %v2545_v4 = vld [vmem:[%s684_s20 + $0x8] sm:$0xff]   ;;  %v2868_v6 = vmov 0.0   ;;  %v2547_v7 = vld [vmem:[%s684_s20] sm:$0xff]   ;;  %vm2869_vm2 = vmmov 0   ;;  %s2870_s16 = smov 8  }
  0xab   : > { %v2546_v5 = vld [vmem:[%s694_s0 + $0x8] sm:$0xff]   ;;  %2259 = vmatprep.subr.bf16.mxu1 %v2868_v6  ;;  %2275 = vmatprep.subr.bf16.mxu0 %v2868_v6  ;;  %v2548_v8 = vld [vmem:[%s694_s0] sm:$0xff]   ;;  %s3639_s0 = sld [smem:[#allocation43_spill]]  ;;  %s2871_s17 = smov 12   ;;  %vm933_vm3 = vcmask 31744   ;;  %vm1146_vm4 = vcmask 64512  }
  0xac   : > { %2260 = vmatpush3.bf16.msra.mxu1 %v2545_v4  ;;  %2276 = vmatpush3.bf16.msra.mxu0 %v2546_v5  ;;  %s2872_s15 = smov 20   ;;  %s3640_s9 = sld [smem:[#allocation42_spill]]  ;;  %v2549_v18 = vld [vmem:[%s3220_s6 + $0x8] sm:$0xff]   ;;  %v2550_v20 = vld [vmem:[%s3220_s6] sm:$0xff]   ;;  %vm1388_vm5 = vcmask 1043456   ;;  %vm1583_vm7 = vcmask 130048  }
  0xad   : > { %2261 = vmatprep.subr.bf16.mxu1 %v2868_v6  ;;  %2277 = vmatprep.subr.bf16.mxu0 %v2868_v6  ;;  %s2873_s3 = smov 16   ;;  %s2874_s26 = smov 28   ;;  %vm1585_vm8 = vcmask 195584   ;;  %vm1837_vm9 = vcmask 785408  }
  0xae   : > { %2263 = vmatprep.mubr.msk.bf16.mxu1 %vm2869_vm2, %v2868_v6  ;;  %2279 = vmatprep.mubr.msk.bf16.mxu0 %vm2869_vm2, %v2868_v6  ;;  %s2875_s22 = smov 24   ;;  %s2876_s20 = smov 4  }
  0xaf   : > { %s3641_s14 = sld [smem:[#allocation32_spill]]  ;;  %s2878_s6 = smov 120  }
  0xb0   : > { %v3241_v1 = vld [vmem:[#allocation2] sm:$0xff]  ;;  %2262 = vmatpush3.bf16.msra.mxu1 %v2547_v7  ;;  %2278 = vmatpush3.bf16.msra.mxu0 %v2548_v8  ;;  %s2879_s11 = smov 112   ;;  %s2880_s13 = smov 104  }
  0xb1   : > { %v722_v2 = vmul.f32 %v3241_v1, %v3241_v1  ;;  %2267 = vmatprep.subr.bf16.mxu1 %v2868_v6  ;;  %2289 = vmatprep.subr.bf16.mxu0 %v2868_v6  ;;  %v3259_v9 = vld [vmem:[%s3639_s0] sm:$0xff]  ;;  %s3644_s7 = scalar_lea.vmem [#allocation9], %s3193_s25 }
  0xb2   : > { %967 = vrot.lane.b32.xlu1 %v3259_v9, %s2870_s16  ;;  %v3268_v10 = vld [vmem:[%s3640_s9] sm:$0xff]  ;;  %s3646_s0 = smov %s3644_s7 }
  0xb3   : > { %v724_v3 = vsel %vm723_vm1, %v722_v2, 0.0 }
  0xb4   : > { %725 = vadd.xlane.f32.xlu0 %v724_v3 }
  0xb5   : > { %s3642_s12 = scalar_lea.vmem %s3641_s14, %s3207_s10  ;;  %s2877_s10 = smov 124  }
  0xb6   : > { %1012 = vrot.lane.b32.xlu1 %v3259_v9, %s2872_s15  ;;  %v2170_v15 = vld [vmem:[%s3642_s12] ss:$0 sm:$0xff] }
  0xba   : > { %1025 = vrot.lane.b32.xlu1 %v3259_v9, %s2873_s3 }
  0xbe   : > { %1070 = vrot.lane.b32.xlu1 %v3259_v9, %s2874_s26 }
  0xc2   : > { %1083 = vrot.lane.b32.xlu1 %v3259_v9, %s2875_s22 }
  0xc6   : > { %913 = vrot.lane.b32.xlu1 %v3259_v9, %s2876_s20 }
  0xca   : > { %954 = vrot.lane.b32.xlu0 %v3259_v9, %s2871_s17  ;;  %950 = vrot.lane.b32.xlu1 %v3268_v10, %s2870_s16 }
  0xce   : > { %963 = vrot.lane.b32.xlu0 %v3268_v10, %s2871_s17  ;;  %1008 = vrot.lane.b32.xlu1 %v3268_v10, %s2873_s3 }
  0xd2   : > { %1021 = vrot.lane.b32.xlu0 %v3268_v10, %s2872_s15  ;;  %1066 = vrot.lane.b32.xlu1 %v3268_v10, %s2875_s22 }
  0xd6   : > { %1079 = vrot.lane.b32.xlu0 %v3268_v10, %s2874_s26 }
 0x124   : > { %v968_v21 = vpop.permute.xlu1 %967 }
 0x128   : > { %v1013_v22 = vpop.permute.xlu1 %1012 }
 0x12c   : > { %v1026_v30 = vpop.permute.xlu1 %1025 }
 0x130   : > { %v1071_v38 = vpop.permute.xlu1 %1070 }
 0x134   : > { %v1084_v44 = vpop.permute.xlu1 %1083 }
 0x138   : > { %v914_v51 = vpop.permute.xlu1 %913 }
 0x13c   : > { %v951_v55 = vpop.permute.xlu1 %950 }
 0x13d   : > { %v726_v11 = vpop.xlane.xlu0 %725 }
 0x13e   : > { %v728_v12 = vmul.f32 0.03125, %v726_v11 }
 0x140   : > { %v729_v13 = vadd.f32 1e-06, %v728_v12  ;;  %v1009_v57 = vpop.permute.xlu1 %1008 }
 0x141   : > { %v955_v23 = vpop.permute.xlu0 %954 }
 0x142   : > { %2563 = vrsqrt.f32 %v729_v13 }
 0x144   : > { %v1067_v59 = vpop.permute.xlu1 %1066 }
 0x145   : > { %v964_v56 = vpop.permute.xlu0 %963 }
 0x149   : > { %v1022_v58 = vpop.permute.xlu0 %1021 }
 0x14d   : > { %v1080_v60 = vpop.permute.xlu0 %1079 }
 0x14f   : > { %v2564_v14 = vpop.eup %2563 }
 0x150   : > { %v731_v16 = vmul.f32 %v2564_v14, %v3241_v1 }
 0x152   : > { %v738_v17 = vmul.f32 %v2170_v15, %v731_v16 }
 0x154   : > { %v739_v19 = vpack.c.bf16 %v738_v17, %v738_v17 }
 0x156   : > { %2264 = vmatmul.mubr.msk.bf16.vlgmr.msra.gmra.mxu1 %vm723_vm1, %v739_v19  ;;  %2280 = vmatmul.mubr.msk.bf16.vlgmr.msra.gmra.mxu0 %vm723_vm1, %v739_v19 }
 0x157   : > { %2268 = vmatpush3.bf16.msra.mxu1 %v2549_v18  ;;  %2271 = vmatprep.mubr.msk.bf16.mxu1 %vm2869_vm2, %v2868_v6 }
 0x158   : > { %2269 = vmatprep.subr.bf16.mxu1 %v2868_v6  ;;  %2291 = vmatprep.mubr.msk.bf16.mxu0 %vm2869_vm2, %v2868_v6 }
 0x15b   : > { %2270 = vmatpush3.bf16.msra.mxu1 %v2550_v20 }
 0x15c   : > { %2283 = vmatprep.subr.bf16.mxu1 %v2868_v6 }
 0x15e   : > { %2272 = vmatmul.mubr.msk.bf16.vlgmr.msra.gmra.mxu1 %vm723_vm1, %v739_v19 }
 0x15f   : > { %2285 = vmatprep.mubr.msk.bf16.mxu1 %vm2869_vm2, %v2868_v6 }
 0x216   : > { %v3305_v24 = vpop.f32.mrf.mxu1  ;;  %v3307_v25 = vpop.f32.mrf.mxu0 }
 0x217   : > { %v970_v26 = vmul.f32 %v968_v21, %v3305_v24  ;;  %v957_v27 = vmul.f32 %v955_v23, %v3305_v24  ;;  %v1028_v47 = vmul.f32 %v1026_v30, %v3305_v24  ;;  %v1015_v48 = vmul.f32 %v1013_v22, %v3305_v24 }
 0x218   : > { %v2265_v28 = vpop.f32.mrf.mxu1  ;;  %v2281_v29 = vpop.f32.mrf.mxu0  ;;  %v1086_v49 = vmul.f32 %v1084_v44, %v3305_v24  ;;  %v1073_v50 = vmul.f32 %v1071_v38, %v3305_v24  ;;  %v916_v54 = vmul.f32 %v914_v51, %v3305_v24  ;;  %v953_v14 = vmul.f32 %v951_v55, %v3305_v24 }
 0x219   : > { %972 = vrot.lane.b32.xlu0 %v970_v26, %s2876_s20  ;;  %959 = vrot.lane.b32.xlu1 %v957_v27, %s2877_s10  ;;  %v966_v15 = vmul.f32 %v964_v56, %v3305_v24  ;;  %v927_v19 = vmul.f32 %v3305_v24, %v3259_v9 }
 0x21a   : > { %v796_v31 = vpop.f32.mrf.mxu1  ;;  %v908_v32 = vpop.f32.mrf.mxu0 }
 0x21b   : > { %v1011_v32 = vmul.f32 %v1009_v57, %v3305_v24 }
 0x21c   : > { %v2266_v33 = vpop.f32.mrf.mxu1  ;;  %v2282_v34 = vpop.f32.mrf.mxu0 }
 0x21e   : > { %v3313_v35 = vpop.f32.mrf.mxu1 }
 0x21f   : > { %v993_v36 = vmul.f32 %v968_v21, %v3313_v35  ;;  %v986_v37 = vmul.f32 %v955_v23, %v3313_v35  ;;  %v1051_v41 = vmul.f32 %v1026_v30, %v3313_v35  ;;  %v1044_v42 = vmul.f32 %v1013_v22, %v3313_v35 }
 0x220   : > { %v2273_v39 = vpop.f32.mrf.mxu1  ;;  %v1109_v45 = vmul.f32 %v1084_v44, %v3313_v35  ;;  %v1102_v46 = vmul.f32 %v1071_v38, %v3313_v35  ;;  %v936_v52 = vmul.f32 %v914_v51, %v3313_v35  ;;  %v943_v53 = vmul.f32 %v3313_v35, %v3259_v9 }
 0x221   : > { %995 = vrot.lane.b32.xlu0 %v993_v36, %s2876_s20  ;;  %988 = vrot.lane.b32.xlu1 %v986_v37, %s2877_s10  ;;  %v985_v63 = vmul.f32 %v951_v55, %v3313_v35  ;;  %v992_v0 = vmul.f32 %v964_v56, %v3313_v35  ;;  %v1043_v8 = vmul.f32 %v1009_v57, %v3313_v35 }
 0x222   : > { %v852_v40 = vpop.f32.mrf.mxu1  ;;  %v1050_v11 = vmul.f32 %v1022_v58, %v3313_v35  ;;  %v1101_v18 = vmul.f32 %v1067_v59, %v3313_v35  ;;  %v1108_v23 = vmul.f32 %v1080_v60, %v3313_v35  ;;  %v1024_v9 = vmul.f32 %v1022_v58, %v3305_v24 }
 0x223   : > { %v1082_v38 = vmul.f32 %v1080_v60, %v3305_v24  ;;  %v1069_v40 = vmul.f32 %v1067_v59, %v3305_v24 }
 0x224   : > { %v2274_v43 = vpop.f32.mrf.mxu1 }
 0x225   : > { %1053 = vrot.lane.b32.xlu0 %v1051_v41, %s2876_s20  ;;  %1046 = vrot.lane.b32.xlu1 %v1044_v42, %s2877_s10 }
 0x229   : > { %1111 = vrot.lane.b32.xlu0 %v1109_v45, %s2876_s20  ;;  %1104 = vrot.lane.b32.xlu1 %v1102_v46, %s2877_s10 }
 0x22d   : > { %1030 = vrot.lane.b32.xlu0 %v1028_v47, %s2876_s20  ;;  %1017 = vrot.lane.b32.xlu1 %v1015_v48, %s2877_s10 }
 0x231   : > { %1088 = vrot.lane.b32.xlu0 %v1086_v49, %s2876_s20  ;;  %1075 = vrot.lane.b32.xlu1 %v1073_v50, %s2877_s10  ;;  %v935_v49 = vmul.f32 %v3313_v35, %v3268_v10 }
 0x235   : > { %938 = vrot.lane.b32.xlu0 %v936_v52, %s2877_s10  ;;  %923 = vrot.lane.b32.xlu1 %v3268_v10, %s2876_s20 }
 0x239   : > { %945 = vrot.lane.b32.xlu1 %v943_v53, %s2876_s20 }
 0x23d   : > { %918 = vrot.lane.b32.xlu1 %v916_v54, %s2877_s10 }
 0x28b   : > { %v960_v61 = vpop.permute.xlu1 %959  ;;  %v973_v62 = vpop.permute.xlu0 %972 }
 0x28c   : > { %v962_v20 = vsub.f32 %v953_v14, %v960_v61  ;;  %v975_v21 = vadd.f32 %v973_v62, %v966_v15 }
 0x28e   : > { %v2520_v30 = vpack.i.bf16 %v975_v21, %v962_v20 }
 0x293   : > { %v989_v2 = vpop.permute.xlu1 %988  ;;  %v996_v3 = vpop.permute.xlu0 %995 }
 0x294   : > { %v991_v4 = vsub.f32 %v985_v63, %v989_v2  ;;  %v998_v5 = vadd.f32 %v996_v3, %v992_v0 }
 0x296   : > { %v2515_v7 = vpack.i.bf16 %v998_v5, %v991_v4 }
 0x297   : > { %v1047_v12 = vpop.permute.xlu1 %1046  ;;  %v1054_v13 = vpop.permute.xlu0 %1053 }
 0x298   : > { %v1049_v16 = vsub.f32 %v1043_v8, %v1047_v12  ;;  %v1056_v17 = vadd.f32 %v1054_v13, %v1050_v11  ;;  %2516 = vrot.lane.b32.xlu0 %v2515_v7, %s2878_s6 }
 0x29a   : > { %v2525_v22 = vpack.i.bf16 %v1056_v17, %v1049_v16 }
 0x29b   : > { %v1105_v26 = vpop.permute.xlu1 %1104  ;;  %v1112_v27 = vpop.permute.xlu0 %1111 }
 0x29c   : > { %v1107_v28 = vsub.f32 %v1101_v18, %v1105_v26  ;;  %v1114_v29 = vadd.f32 %v1112_v27, %v1108_v23  ;;  %929 = vrot.lane.b32.xlu0 %v927_v19, %s2876_s20  ;;  %2526 = vrot.lane.b32.xlu1 %v2525_v22, %s2879_s11 }
 0x29e   : > { %v2530_v31 = vpack.i.bf16 %v1114_v29, %v1107_v28  ;;  %v1142_v29 = vpack.c.bf16 %v3307_v25, %v3307_v25 }
 0x29f   : > { %v1018_v33 = vpop.permute.xlu1 %1017  ;;  %v1031_v34 = vpop.permute.xlu0 %1030 }
 0x2a0   : > { %v1020_v36 = vsub.f32 %v1011_v32, %v1018_v33  ;;  %v1033_v37 = vadd.f32 %v1031_v34, %v1024_v9  ;;  %2521 = vrot.lane.b32.xlu0 %v2520_v30, %s2878_s6  ;;  %2531 = vrot.lane.b32.xlu1 %v2530_v31, %s2880_s13  ;;  %v1390_v34 = vsel %vm1388_vm5, %v1142_v29, 0 }
 0x2a2   : > { %v2535_v39 = vpack.i.bf16 %v1033_v37, %v1020_v36 }
 0x2a3   : > { %v1076_v41 = vpop.permute.xlu1 %1075  ;;  %v1089_v42 = vpop.permute.xlu0 %1088 }
 0x2a4   : > { %v1078_v43 = vsub.f32 %v1069_v40, %v1076_v41  ;;  %v1091_v44 = vadd.f32 %v1089_v42, %v1082_v38  ;;  %2536 = vrot.lane.b32.xlu0 %v2535_v39, %s2879_s11  ;;  %v716_v38 = vlaneseq }
 0x2a6   : > { %v2540_v45 = vpack.i.bf16 %v1091_v44, %v1078_v43  ;;  %v717_v39 = vshrl.u32 %v716_v38, 7  ;;  %v719_v40 = vand.u32 127, %v716_v38 }
 0x2a7   : > { %v924_v46 = vpop.permute.xlu1 %923  ;;  %v939_v47 = vpop.permute.xlu0 %938 }
 0x2a8   : > { %2541 = vrot.lane.b32.xlu1 %v2540_v45, %s2880_s13  ;;  %v942_v48 = vmul.f32 %v924_v46, %v3313_v35  ;;  %v941_v51 = vsub.f32 %v935_v49, %v939_v47  ;;  %v926_v60 = vmul.f32 %v924_v46, %v3305_v24  ;;  %v911_v35 = vmul.f32 %v3305_v24, %v3268_v10 }
 0x2a9   : > { %vm720_vm6 = vcmp.le.s32.totalorder %v719_v40, %v717_v39 }
 0x2ab   : > { %v946_v50 = vpop.permute.xlu1 %945 }
 0x2ac   : > { %v948_v52 = vadd.f32 %v946_v50, %v942_v48 }
 0x2ae   : > { %v949_v53 = vsel %vm933_vm3, %v941_v51, %v948_v52 }
 0x2af   : > { %v1128_v54 = vpack.c.bf16 %v949_v53, %v949_v53  ;;  %v919_v56 = vpop.permute.xlu1 %918 }
 0x2b0   : > { %v921_v2 = vsub.f32 %v911_v35, %v919_v56 }
 0x2b1   : > { %v1151_v55 = vsel %vm1146_vm4, %v1128_v54, 0 }
 0x2b2   : > { %2284 = vmatpush3.bf16.xpose.msra.mxu1 %v1151_v55 }
 0x2b3   : > { %2295 = vmatprep.subr.bf16.mxu1 %v2868_v6 }
 0x30a   : > { %v2517_v57 = vpop.permute.xlu0 %2516 }
 0x30b   : > { %v2519_v58 = vunpack.i.h.bf16 %v2517_v57  ;;  %v2518_v59 = vunpack.i.l.bf16 %v2517_v57 }
 0x30d   : > { %v1007_v61 = vsel %vm933_vm3, %v2518_v59, %v2519_v58 }
 0x30e   : > { %v2527_v62 = vpop.permute.xlu1 %2526  ;;  %v930_v63 = vpop.permute.xlu0 %929  ;;  %v1129_v0 = vpack.c.bf16 %v1007_v61, %v1007_v61 }
 0x30f   : > { %v2529_v3 = vunpack.i.h.bf16 %v2527_v62  ;;  %v2528_v4 = vunpack.i.l.bf16 %v2527_v62  ;;  %v932_v5 = vadd.f32 %v930_v63, %v926_v60 }
 0x310   : > { %v1197_v7 = vsel %vm1146_vm4, %v1129_v0, 0 }
 0x311   : > { %v934_v8 = vsel %vm933_vm3, %v921_v2, %v932_v5  ;;  %2290 = vmatpush3.bf16.xpose.msra.mxu0 %v1197_v7  ;;  %v1065_v11 = vsel %vm933_vm3, %v2528_v4, %v2529_v3 }
 0x312   : > { %v1124_v12 = vpack.c.bf16 %v934_v8, %v934_v8  ;;  %v2532_v13 = vpop.permute.xlu1 %2531  ;;  %v2522_v14 = vpop.permute.xlu0 %2521  ;;  %v1130_v10 = vpack.c.bf16 %v1065_v11, %v1065_v11  ;;  %2301 = vmatprep.subr.bf16.mxu0 %v2868_v6 }
 0x313   : > { %v2534_v24 = vunpack.i.h.bf16 %v2532_v13  ;;  %v2533_v15 = vunpack.i.l.bf16 %v2532_v13  ;;  %v2524_v16 = vunpack.i.h.bf16 %v2522_v14  ;;  %v2523_v17 = vunpack.i.l.bf16 %v2522_v14 }
 0x314   : > { %2286 = vmatmul.mubr.msk.bf16.vlgmr.msra.gmra.mxu1 %vm1146_vm4, %v1124_v12  ;;  %v1243_v18 = vsel %vm1146_vm4, %v1130_v10, 0 }
 0x315   : > { %v984_v19 = vsel %vm933_vm3, %v2523_v17, %v2524_v16  ;;  %2296 = vmatpush3.bf16.xpose.msra.mxu1 %v1243_v18  ;;  %v1123_v20 = vsel %vm933_vm3, %v2533_v15, %v2534_v24  ;;  %2297 = vmatprep.mubr.msk.bf16.mxu1 %vm2869_vm2, %v2868_v6 }
 0x316   : > { %v1125_v21 = vpack.c.bf16 %v984_v19, %v984_v19  ;;  %v2537_v22 = vpop.permute.xlu0 %2536  ;;  %v1131_v23 = vpack.c.bf16 %v1123_v20, %v1123_v20  ;;  %2307 = vmatprep.subr.bf16.mxu1 %v2868_v6 }
 0x317   : > { %v2539_v26 = vunpack.i.h.bf16 %v2537_v22  ;;  %v2538_v27 = vunpack.i.l.bf16 %v2537_v22 }
 0x318   : > { %2292 = vmatmul.mubr.msk.bf16.vlgmr.msra.gmra.mxu0 %vm1146_vm4, %v1125_v21  ;;  %v1289_v28 = vsel %vm1146_vm4, %v1131_v23, 0 }
 0x319   : > { %v1042_v30 = vsel %vm933_vm3, %v2538_v27, %v2539_v26  ;;  %2302 = vmatpush3.bf16.xpose.msra.mxu0 %v1289_v28  ;;  %2303 = vmatprep.mubr.msk.bf16.mxu0 %vm2869_vm2, %v2868_v6 }
 0x31a   : > { %v1126_v31 = vpack.c.bf16 %v1042_v30, %v1042_v30  ;;  %v2542_v32 = vpop.permute.xlu1 %2541  ;;  %2313 = vmatprep.subr.bf16.mxu0 %v2868_v6 }
 0x31b   : > { %v2544_v9 = vunpack.i.h.bf16 %v2542_v32  ;;  %v2543_v33 = vunpack.i.l.bf16 %v2542_v32 }
 0x31c   : > { %2298 = vmatmul.mubr.msk.bf16.vlgmr.msra.gmra.mxu1 %vm1146_vm4, %v1126_v31 }
 0x31d   : > { %v1100_v36 = vsel %vm933_vm3, %v2543_v33, %v2544_v9  ;;  %2308 = vmatpush3.bf16.msra.mxu1 %v1390_v34  ;;  %2309 = vmatprep.mubr.msk.bf16.mxu1 %vm2869_vm2, %v2868_v6 }
 0x31e   : > { %v1127_v37 = vpack.c.bf16 %v1100_v36, %v1100_v36  ;;  %2319 = vmatprep.subr.bf16.mxu1 %v2868_v6 }
 0x320   : > { %2304 = vmatmul.mubr.msk.bf16.vlgmr.msra.gmra.mxu0 %vm1146_vm4, %v1127_v37 }
 0x321   : > { %2315 = vmatprep.mubr.msk.bf16.mxu0 %vm2869_vm2, %v2868_v6 }
 0x3d4   : > { %v1187_v41 = vpop.f32.mrf.mxu1 }
 0x3d5   : > { %v1333_v42 = vsel %vm720_vm6, %v1187_v41, -1e+30 }
 0x3d6   : > { %v2287_v43 = vpop.f32.mrf.mxu1  ;;  %v1337_v44 = vsel %vm1146_vm4, %v1333_v42, -inf }
 0x3d7   : > { %1338 = vmax.xlane.f32.xlu0 %v1337_v44 }
 0x3d8   : > { %v1190_v45 = vpop.f32.mrf.mxu1  ;;  %v1233_v46 = vpop.f32.mrf.mxu0 }
 0x3d9   : > { %v1334_v47 = vsel %vm720_vm6, %v1233_v46, -1e+30 }
 0x3da   : > { %v2288_v48 = vpop.f32.mrf.mxu1  ;;  %v2293_v49 = vpop.f32.mrf.mxu0  ;;  %v1340_v50 = vsel %vm1146_vm4, %v1334_v47, -inf }
 0x3db   : > { %1341 = vmax.xlane.f32.xlu1 %v1340_v50  ;;  %v2551_v48 = vld [vmem:[%s3228_s28 + $0x8] sm:$0xff]   ;;  %v2552_v50 = vld [vmem:[%s3228_s28] sm:$0xff]   ;;  %s3643_s28 = scalar_lea.vmem [#allocation8], %s3193_s25 }
 0x3dc   : > { %v1236_v51 = vpop.f32.mrf.mxu0  ;;  %v1279_v52 = vpop.f32.mrf.mxu1  ;;  %s3645_s8 = smov %s3643_s28 }
 0x3dd   : > { %v1335_v53 = vsel %vm720_vm6, %v1279_v52, -1e+30 }
 0x3de   : > { %v2294_v54 = vpop.f32.mrf.mxu0  ;;  %v2299_v55 = vpop.f32.mrf.mxu1  ;;  %v1343_v56 = vsel %vm1146_vm4, %v1335_v53, -inf }
 0x3df   : > { %1344 = vmax.xlane.f32.xlu0 %v1343_v56 }
 0x3e0   : > { %v1282_v57 = vpop.f32.mrf.mxu1  ;;  %v1325_v58 = vpop.f32.mrf.mxu0 }
 0x3e1   : > { %v1336_v59 = vsel %vm720_vm6, %v1325_v58, -1e+30 }
 0x3e2   : > { %v2300_v60 = vpop.f32.mrf.mxu1  ;;  %v2305_v35 = vpop.f32.mrf.mxu0  ;;  %v1346_v61 = vsel %vm1146_vm4, %v1336_v59, -inf }
 0x3e3   : > { %1347 = vmax.xlane.f32.xlu0 %v1346_v61 }
 0x3e4   : > { %v1328_v62 = vpop.f32.mrf.mxu0 }
 0x3e6   : > { %v2306_v63 = vpop.f32.mrf.mxu0 }
 0x3ec   : > { %1133 = vrot.lane.b32.xlu1 %v3307_v25, %s2878_s6 }
 0x460   : > { %v1339_v0 = vpop.xlane.xlu0 %1338 }
 0x461   : > { %v1349_v2 = vsub.f32 %v1333_v42, %v1339_v0 }
 0x463   : > { %v1353_v3 = vmul.f32 1.442695, %v1349_v2 }
 0x464   : > { %v1342_v4 = vpop.xlane.xlu1 %1341 }
 0x465   : > { %2565 = vpow2.f32 %v1353_v3  ;;  %v1350_v5 = vsub.f32 %v1334_v47, %v1342_v4 }
 0x467   : > { %v1355_v7 = vmul.f32 1.442695, %v1350_v5 }
 0x468   : > { %v1345_v8 = vpop.xlane.xlu0 %1344  ;;  %v1134_v11 = vpop.permute.xlu1 %1133 }
 0x469   : > { %2567 = vpow2.f32 %v1355_v7  ;;  %v1351_v12 = vsub.f32 %v1335_v53, %v1345_v8  ;;  %v1143_v13 = vpack.c.bf16 %v1134_v11, %v1134_v11 }
 0x46b   : > { %v1357_v14 = vmul.f32 1.442695, %v1351_v12  ;;  %v1436_v10 = vsel %vm1388_vm5, %v1143_v13, 0 }
 0x46c   : > { %2314 = vmatpush3.bf16.msra.mxu0 %v1436_v10  ;;  %v1348_v24 = vpop.xlane.xlu0 %1347 }
 0x46d   : > { %2569 = vpow2.f32 %v1357_v14  ;;  %v1352_v15 = vsub.f32 %v1336_v59, %v1348_v24  ;;  %2325 = vmatprep.subr.bf16.mxu0 %v2868_v6 }
 0x46f   : > { %v1359_v16 = vmul.f32 1.442695, %v1352_v15 }
 0x471   : > { %2571 = vpow2.f32 %v1359_v16 }
 0x472   : > { %v2566_v17 = vpop.eup %2565 }
 0x473   : > { %v1361_v18 = vsel %vm1146_vm4, %v2566_v17, 0.0 }
 0x474   : > { %1362 = vadd.xlane.f32.xlu1 %v1361_v18  ;;  %v2554_v18 = vld [vmem:[%s3644_s7 + $0x8] sm:$0xff]  }
 0x476   : > { %v2568_v19 = vpop.eup %2567 }
 0x477   : > { %v1364_v20 = vsel %vm1146_vm4, %v2568_v19, 0.0 }
 0x478   : > { %1365 = vadd.xlane.f32.xlu0 %v1364_v20 }
 0x47a   : > { %v2570_v21 = vpop.eup %2569 }
 0x47b   : > { %v1367_v22 = vsel %vm1146_vm4, %v2570_v21, 0.0 }
 0x47c   : > { %1368 = vadd.xlane.f32.xlu1 %v1367_v22 }
 0x47e   : > { %v2572_v23 = vpop.eup %2571 }
 0x47f   : > { %v1370_v26 = vsel %vm1146_vm4, %v2572_v23, 0.0 }
 0x480   : > { %1371 = vadd.xlane.f32.xlu0 %v1370_v26  ;;  %v2191_v26 = vld [vmem:[%s3187_s2] ss:$0 sm:$0xff]  ;;  %s3647_s2 = sld [smem:[#allocation21_spill]] }
 0x486   : > { %p2206_p5 = scmp.ne.s32.totalorder %s3647_s2, 1 }
 0x48d   : > { %1139 = vrot.lane.b32.xlu1 %v3307_v25, %s2880_s13 }
 0x496   : > { %1136 = vrot.lane.b32.xlu0 %v3307_v25, %s2879_s11 }
 0x4fd   : > { %v1363_v27 = vpop.xlane.xlu1 %1362 }
 0x4fe   : > { %2573 = vrcp.f32 %v1363_v27 }
 0x501   : > { %v1366_v28 = vpop.xlane.xlu0 %1365 }
 0x502   : > { %2575 = vrcp.f32 %v1366_v28 }
 0x505   : > { %v1369_v29 = vpop.xlane.xlu1 %1368 }
 0x506   : > { %2577 = vrcp.f32 %v1369_v29 }
 0x509   : > { %v1372_v30 = vpop.xlane.xlu0 %1371  ;;  %v1140_v9 = vpop.permute.xlu1 %1139 }
 0x50a   : > { %2579 = vrcp.f32 %v1372_v30  ;;  %v1145_v38 = vpack.c.bf16 %v1140_v9, %v1140_v9  ;;  %v2557_v30 = vld [vmem:[%s3234_s23 + $0x28] sm:$0xff]   ;;  %v2560_v9 = vld [vmem:[%s3234_s23 + $0x10] sm:$0xff]  }
 0x50b   : > { %v2574_v31 = vpop.eup %2573 }
 0x50c   : > { %v1377_v32 = vmul.f32 %v2574_v31, %v2566_v17  ;;  %v1528_v42 = vsel %vm1388_vm5, %v1145_v38, 0  ;;  %v2553_v17 = vld [vmem:[%s3643_s28 + $0x8] sm:$0xff]  }
 0x50d   : > { %v1137_v33 = vpop.permute.xlu0 %1136  ;;  %v2558_v31 = vld [vmem:[%s3234_s23 + $0x20] sm:$0xff]  }
 0x50e   : > { %v1144_v34 = vpack.c.bf16 %v1137_v33, %v1137_v33  ;;  %v1381_v36 = vpack.c.bf16 %v1377_v32, %v1377_v32  ;;  %v2559_v32 = vld [vmem:[%s3234_s23 + $0x18] sm:$0xff]   ;;  %v2561_v33 = vld [vmem:[%s3234_s23 + $0x8] sm:$0xff]  }
 0x50f   : > { %v2576_v37 = vpop.eup %2575 }
 0x510   : > { %v1482_v39 = vsel %vm1388_vm5, %v1144_v34, 0  ;;  %2310 = vmatmul.mubr.msk.bf16.vlgmr.msra.gmra.mxu1 %vm1146_vm4, %v1381_v36  ;;  %v1378_v25 = vmul.f32 %v2576_v37, %v2568_v19  ;;  %v2555_v19 = vld [vmem:[%s3645_s8] sm:$0xff]  }
 0x511   : > { %2320 = vmatpush3.bf16.msra.mxu1 %v1482_v39  ;;  %2321 = vmatprep.mubr.msk.bf16.mxu1 %vm2869_vm2, %v2868_v6  ;;  %v2562_v34 = vld [vmem:[%s3234_s23] sm:$0xff]  }
 0x512   : > { %v1382_v40 = vpack.c.bf16 %v1378_v25, %v1378_v25  ;;  %2331 = vmatprep.subr.bf16.mxu1 %v2868_v6 }
 0x513   : > { %v2578_v41 = vpop.eup %2577 }
 0x514   : > { %2316 = vmatmul.mubr.msk.bf16.vlgmr.msra.gmra.mxu0 %vm1146_vm4, %v1382_v40  ;;  %v1379_v43 = vmul.f32 %v2578_v41, %v2570_v21 }
 0x515   : > { %2326 = vmatpush3.bf16.msra.mxu0 %v1528_v42  ;;  %2327 = vmatprep.mubr.msk.bf16.mxu0 %vm2869_vm2, %v2868_v6 }
 0x516   : > { %v1383_v44 = vpack.c.bf16 %v1379_v43, %v1379_v43  ;;  %2339 = vmatprep.subr.bf16.mxu0 %v2868_v6 }
 0x517   : > { %v2580_v45 = vpop.eup %2579 }
 0x518   : > { %2322 = vmatmul.mubr.msk.bf16.vlgmr.msra.gmra.mxu1 %vm1146_vm4, %v1383_v44  ;;  %v1380_v46 = vmul.f32 %v2580_v45, %v2572_v23 }
 0x519   : > { %2335 = vmatprep.mubr.msk.bf16.mxu1 %vm2869_vm2, %v2868_v6  ;;  %2332 = vmatpush3.bf16.msra.mxu1 %v2551_v48 }
 0x51a   : > { %v1384_v47 = vpack.c.bf16 %v1380_v46, %v1380_v46  ;;  %2333 = vmatprep.subr.bf16.mxu1 %v2868_v6 }
 0x51c   : > { %2328 = vmatmul.mubr.msk.bf16.vlgmr.msra.gmra.mxu0 %vm1146_vm4, %v1384_v47 }
 0x51d   : > { %2343 = vmatprep.mubr.msk.bf16.mxu0 %vm2869_vm2, %v2868_v6  ;;  %2334 = vmatpush3.bf16.msra.mxu1 %v2552_v50 }
 0x51e   : > { %2347 = vmatprep.subr.bf16.mxu1 %v2868_v6  ;;  %2340 = vmatpush3.bf16.msra.mxu0 %v2553_v17 }
 0x51f   : > { %2341 = vmatprep.subr.bf16.mxu0 %v2868_v6 }
 0x522   : > { %2342 = vmatpush3.bf16.msra.mxu0 %v2555_v19 }
 0x523   : > { %2355 = vmatprep.subr.bf16.mxu0 %v2868_v6 }
 0x5d0   : > { %v1426_v49 = vpop.f32.mrf.mxu1 }
 0x5d2   : > { %v2311_v51 = vpop.f32.mrf.mxu1 }
 0x5d4   : > { %v1429_v52 = vpop.f32.mrf.mxu1  ;;  %v1472_v53 = vpop.f32.mrf.mxu0 }
 0x5d5   : > { %1571 = vrot.lane.b32.xlu1 %v1472_v53, %s2870_s16 }
 0x5d6   : > { %v2312_v54 = vpop.f32.mrf.mxu1  ;;  %v2317_v55 = vpop.f32.mrf.mxu0 }
 0x5d8   : > { %v1475_v56 = vpop.f32.mrf.mxu0  ;;  %v1518_v57 = vpop.f32.mrf.mxu1 }
 0x5d9   : > { %1575 = vrot.lane.b32.xlu0 %v1518_v57, %s2873_s3 }
 0x5da   : > { %v2318_v58 = vpop.f32.mrf.mxu0  ;;  %v2323_v59 = vpop.f32.mrf.mxu1 }
 0x5dc   : > { %v1521_v60 = vpop.f32.mrf.mxu1  ;;  %v1564_v35 = vpop.f32.mrf.mxu0 }
 0x5dd   : > { %1579 = vrot.lane.b32.xlu1 %v1564_v35, %s2875_s22 }
 0x5de   : > { %v2324_v61 = vpop.f32.mrf.mxu1  ;;  %v2329_v62 = vpop.f32.mrf.mxu0 }
 0x5e0   : > { %v1567_v63 = vpop.f32.mrf.mxu0 }
 0x5e2   : > { %v2330_v0 = vpop.f32.mrf.mxu0 }
 0x647   : > { %v1572_v2 = vpop.permute.xlu1 %1571 }
 0x648   : > { %v1582_v4 = vsel %vm1146_vm4, %v1426_v49, %v1572_v2 }
 0x64b   : > { %v1576_v3 = vpop.permute.xlu0 %1575 }
 0x64c   : > { %v1584_v5 = vsel %vm1583_vm7, %v1582_v4, %v1576_v3 }
 0x64f   : > { %v1580_v7 = vpop.permute.xlu1 %1579 }
 0x650   : > { %v1586_v8 = vsel %vm1585_vm8, %v1584_v5, %v1580_v7 }
 0x651   : > { %v1587_v11 = vpack.c.bf16 %v1586_v8, %v1586_v8 }
 0x653   : > { %2336 = vmatmul.mubr.msk.bf16.vlgmr.msra.gmra.mxu1 %vm723_vm1, %v1587_v11 }
 0x654   : > { %2351 = vmatprep.mubr.msk.bf16.mxu1 %vm2869_vm2, %v2868_v6  ;;  %2348 = vmatpush3.bf16.msra.mxu1 %v2554_v18 }
 0x655   : > { %2349 = vmatprep.subr.bf16.mxu1 %v2868_v6 }
 0x713   : > { %v1641_v12 = vpop.f32.mrf.mxu1 }
 0x714   : > { %v3451_v13 = vadd.f32 %v1641_v12, %v3241_v1  ;;  %v2556_v1 = vld [vmem:[%s3646_s0] sm:$0xff]  }
 0x715   : > { %v2337_v14 = vpop.f32.mrf.mxu1  ;;  %2350 = vmatpush3.bf16.msra.mxu1 %v2556_v1 }
 0x716   : > { %v1649_v10 = vmul.f32 %v3451_v13, %v3451_v13 }
 0x717   : > { %v1644_v24 = vpop.f32.mrf.mxu1 }
 0x718   : > { %v1650_v15 = vsel %vm723_vm1, %v1649_v10, 0.0 }
 0x719   : > { %1651 = vadd.xlane.f32.xlu0 %v1650_v15  ;;  %v2338_v16 = vpop.f32.mrf.mxu1 }
 0x7a2   : > { %v1652_v20 = vpop.xlane.xlu0 %1651 }
 0x7a3   : > { %v1653_v21 = vmul.f32 0.03125, %v1652_v20 }
 0x7a5   : > { %v1654_v22 = vadd.f32 1e-06, %v1653_v21 }
 0x7a7   : > { %2581 = vrsqrt.f32 %v1654_v22 }
 0x7b4   : > { %v2582_v23 = vpop.eup %2581 }
 0x7b5   : > { %v1656_v27 = vmul.f32 %v2582_v23, %v3451_v13 }
 0x7b7   : > { %v1663_v28 = vmul.f32 %v2191_v26, %v1656_v27 }
 0x7b9   : > { %v1664_v29 = vpack.c.bf16 %v1663_v28, %v1663_v28 }
 0x7bb   : > { %2344 = vmatmul.mubr.msk.bf16.vlgmr.msra.gmra.mxu0 %vm723_vm1, %v1664_v29  ;;  %2352 = vmatmul.mubr.msk.bf16.vlgmr.msra.gmra.mxu1 %vm723_vm1, %v1664_v29 }
 0x7bc   : > { %2367 = vmatprep.mubr.msk.bf16.mxu0 %vm2869_vm2, %v2868_v6  ;;  %2356 = vmatpush3.bf16.msra.mxu0 %v2557_v30 }
 0x7bd   : > { %2357 = vmatprep.subr.bf16.mxu0 %v2868_v6 }
 0x7c0   : > { %2358 = vmatpush3.bf16.msra.mxu0 %v2558_v31 }
 0x7c1   : > { %2359 = vmatprep.subr.bf16.mxu0 %v2868_v6 }
 0x7c4   : > { %2360 = vmatpush3.bf16.msra.mxu0 %v2559_v32 }
 0x7c5   : > { %2361 = vmatprep.subr.bf16.mxu0 %v2868_v6 }
 0x7c8   : > { %2362 = vmatpush3.bf16.msra.mxu0 %v2560_v9 }
 0x7c9   : > { %2363 = vmatprep.subr.bf16.mxu0 %v2868_v6 }
 0x7cc   : > { %2364 = vmatpush3.bf16.msra.mxu0 %v2561_v33 }
 0x7cd   : > { %2365 = vmatprep.subr.bf16.mxu0 %v2868_v6 }
 0x7d0   : > { %2366 = vmatpush3.bf16.msra.mxu0 %v2562_v34 }
 0x87b   : > { %v1718_v36 = vpop.f32.mrf.mxu0  ;;  %v1774_v37 = vpop.f32.mrf.mxu1 }
 0x87c   : > { %v2198_v38 = vmul.f32 -1.442695, %v1774_v37 }
 0x87d   : > { %v2345_v39 = vpop.f32.mrf.mxu0  ;;  %v2353_v25 = vpop.f32.mrf.mxu1 }
 0x87e   : > { %2583 = vpow2.f32 %v2198_v38 }
 0x87f   : > { %v1721_v40 = vpop.f32.mrf.mxu0  ;;  %v1777_v41 = vpop.f32.mrf.mxu1 }
 0x881   : > { %v2346_v42 = vpop.f32.mrf.mxu0  ;;  %v2354_v43 = vpop.f32.mrf.mxu1 }
 0x88b   : > { %v2584_v44 = vpop.eup %2583 }
 0x88c   : > { %v1783_v45 = vadd.f32 1.0, %v2584_v44 }
 0x88e   : > { %2585 = vrcp.f32 %v1783_v45 }
 0x89b   : > { %v2586_v46 = vpop.eup %2585 }
 0x89c   : > { %v1786_v47 = vmul.f32 %v2586_v46, %v1774_v37 }
 0x89e   : > { %v1787_v48 = vmul.f32 %v1786_v47, %v1718_v36 }
 0x8a0   : > { %v1788_v6 = vpack.c.bf16 %v1787_v48, %v1787_v48 }
 0x8a2   : > { %2368 = vmatmul.mubr.msk.bf16.vlgmr.msra.gmra.mxu0 %vm1837_vm9, %v1788_v6 }
 0x962   : > { %v1875_v49 = vpop.f32.mrf.mxu0 }
 0x963   : > { %v1881_v50 = vadd.f32 %v1875_v49, %v3451_v13 }
 0x964   : > { %v2369_v51 = vpop.f32.mrf.mxu0  ;;  %1886 = sbr.rel (%p2206_p5) target bundleno = 2573 (0xa0d), region = 100 }
 0x965   : > { %1882 = vst.msk [vmem:[#allocation2] sm:$0xff] %vm723_vm1, %v1881_v50 }
 0x966   : > { %v1878_v52 = vpop.f32.mrf.mxu0 }
 0x968   : > { %v2370_v53 = vpop.f32.mrf.mxu0 }
 0x969   : > { %v1888_v54 = vmul.f32 %v1881_v50, %v1881_v50  ;;  %v2207_v60 = vld [vmem:[#allocation11] ss:$0 sm:$0xff] }
 0x96b   : > { %v1889_v55 = vsel %vm723_vm1, %v1888_v54, 0.0 }
 0x96c   : > { %1890 = vadd.xlane.f32.xlu0 %v1889_v55 }
 0x9f5   : > { %v1891_v56 = vpop.xlane.xlu0 %1890 }
 0x9f6   : > { %v1892_v57 = vmul.f32 0.03125, %v1891_v56 }
 0x9f8   : > { %v1893_v58 = vadd.f32 1e-06, %v1892_v57 }
 0x9fa   : > { %2587 = vrsqrt.f32 %v1893_v58 }
 0xa07   : > { %v2588_v59 = vpop.eup %2587 }
 0xa08   : > { %v1895_v35 = vmul.f32 %v2588_v59, %v1881_v50 }
 0xa0a   : > { %v1902_v61 = vmul.f32 %v2207_v60, %v1895_v35 }
 0xa0c   : > { %1903 = vst.msk [vmem:[%s3238_s24] sm:$0xff] %vm723_vm1, %v1902_v61 }
 0xa0d PF: > { %s3648_s25 = sld [smem:[#allocation22_spill]]  ;;  %s1918_s9 = sshll.u32 %s3238_s24, 4  ;;  %s1919_s9 = int_to_ptr.vmem [resolvable:$true] %s1918_s9 }
 0xa0e   : > { %s3649_s23 = sld [smem:[#allocation29_spill]]  ;;  %s1905_s3 = scalar_lea.sflag [#allocation5], %s3175_s27 }
 0xa0f   : > { %s3650_s5 = sld [smem:[#allocation44_spill]]  ;;  %s2727_s26 = scalar_lea.vmem %s1919_s9, 128 }
 0xa10   : > { %p2728_p8 = scmp.ne.s32.totalorder %s1919_s9, %s2727_s26  ;;  %s2881_s22 = smov [#allocation12]  }
 0xa11   : > { %s2731_s20 = sshll.u32 %s2881_s22, 4  ;;  %s2732_s20 = int_to_ptr.vmem [resolvable:$false] %s2731_s20 }
 0xa12   : > { %s2733_s19 = scalar_lea.vmem %s2732_s20, 256  ;;  %p2734_p2 = scmp.lt.s32.totalorder %s1919_s9, %s2732_s20 }
 0xa13   : > { %s2209_s16 = sshll.u32 %s3648_s25, 7  ;;  %p2735_p3 = scmp.lt.s32.totalorder %s2733_s19, %s2727_s26 }
 0xa14   : > { %p3651_p1 = scmp.ne.s32.totalorder %s3649_s23, 0 }
 0xa15   : > { %s1916_s21 = scalar_lea.hbm %s3650_s5, %s2209_s16  ;;  %p2736_p7 = por %p2735_p3, %p2734_p2 }
 0xa16   : > { %p2729_p0 = pnand %p2728_p8, %p3651_p1 }
 0xa18   : > { %p2730_p13 = pneg %p2729_p0 }
 0xa1a   : > { %p2737_p9 = pnand %p2736_p7, %p2730_p13 }
 0xa1c   : > { %2740 = shalt.err (!%p2737_p9)
}
 0xa1d   : > { %s2741_s4 = scalar_lea.hbm %s1916_s21, 128  ;;  %s2745_s14 = scalar_lea.hbm %s3650_s5, 256 }
 0xa1e   : > { %p2742_p11 = scmp.ne.s32.totalorder %s1916_s21, %s2741_s4  ;;  %p2746_p12 = scmp.lt.s32.totalorder %s1916_s21, %s3650_s5 }
 0xa1f   : > { %p2747_p6 = scmp.lt.s32.totalorder %s2745_s14, %s2741_s4 }
 0xa20   : > { %p2743_p4 = pnand %p2742_p11, %p3651_p1 }
 0xa21   : > { %p2748_p5 = por %p2747_p6, %p2746_p12 }
 0xa22   : > { %p2744_p10 = pneg %p2743_p4 }
 0xa24   : > { %p2749_p8 = pnand %p2748_p5, %p2744_p10 }
 0xa26   : > { %2752 = shalt.err (!%p2749_p8)
}
 0xa27   : > { %2384 = dma.vmem_to_hbm [thread:$0]  (%p3651_p1), %s1919_s9, 128, %s1916_s21, %s1905_s3  }
 0xa28 PF: > { %s3652_s6 = sld [smem:[#allocation20_spill]]  ;;  %p2410_p0 = scmp.ge.s32.totalorder %s2859_s18, 2 }
 0xa29   : > { %s3653_s11 = sld [smem:[#allocation26_spill]] }
 0xa2e   : > { %s1930_s13 = sand.u32 1, %s3652_s6  }
 0xa2f   : > { %p3654_p13 = scmp.ne.s32.totalorder %s3653_s11, 0  ;;  %s1931_s28 = scalar_lea.sflag [#allocation5], %s1930_s13 }
 0xa31   : > { %p2404_p2 = pnand %p2410_p0, %p3654_p13 }
 0xa33   : > { %p2405_p3 = pneg %p2404_p2 }
 0xa35   : > { %2814 = dma.done.wait (%p2405_p3), %s1931_s28, 128  }
 0xa36   : > { %2816 = vsyncadd (%p2405_p3), %s1931_s28, 4294967168  ;;  %s35_s18 = sadd.s32 1, %s2859_s18   ;;  %s3655_s25 = sld [smem:[#allocation18_spill]] }
 0xa37   : > { %p32_p7 = scmp.ge.s32.totalorder %s35_s18, 6   ;;  %s3656_s26 = sld [smem:[#allocation19_spill]] }
 0xa38   : > { %s3657_s27 = sld [smem:[#allocation28_spill]]  ;;  %s3662_s28 = smov %s2835_s29 }
 0xa39   : > { %s3658_s14 = sld [smem:[#allocation23_spill]]  ;;  %s3663_s29 = smov %s2839_s30 }
 0xa3a   : > { %s3659_s15 = sld [smem:[#allocation24_spill]]  ;;  %s3664_s30 = smov %s3126_s1 }
 0xa3b   : > { %s3660_s16 = sld [smem:[#allocation27_spill]]  ;;  %34 = sbr.rel (!%p32_p7) target bundleno = 28 (0x1c), region = 184 }
 0xa3c   : > { %s3661_s17 = sld [smem:[#allocation30_spill]] }
 0xa40   :  { %1936 = vsyncpa [#allocation4], 1 }
 0xa41   :  { %1938 = vsyncpa [#allocation4 + $0x1], 1 }
 0xa42   :  { %1939 = vsyncpa [#allocation7], 1 }
 0xa43   :  { %1941 = vsyncpa [#allocation7 + $0x1], 1 }
 0xa44   :  { %1942 = vsyncpa [#allocation10], 1 }
 0xa45   :  { %1944 = vsyncpa [#allocation10 + $0x1], 1 }
 0xa46   :  { %1945 = vsyncpa [#allocation5], 1 }
 0xa47   :  { %1947 = vsyncpa [#allocation5 + $0x1], 1 }

</bundles_post_ra>
